<compile_context>
chip_gen: v7x
topology: tpu7x:2x2x1
jax: 0.10.0
libtpu: 0.0.40
codegen_flags: <defaults>
</compile_context>

<pallas_src>
import functools

import jax
import jax.numpy as jnp
from jax import lax
from jax.experimental import pallas as pl
from jax.experimental.pallas import tpu as pltpu

BN_EPS = 1e-5


def _round_up(x, m):
    return ((x + m - 1) // m) * m


def _pick_divisor(total, cap):
    """Largest divisor of `total` that is <= cap (falls back to total)."""
    cap = max(1, min(cap, total))
    if total <= cap:
        return total
    for d in range(cap, 0, -1):
        if total % d == 0:
            return d
    return total


def _pick_row_tile(total, cap, align=8):
    """Largest divisor of `total` <= cap that is a multiple of `align`."""
    cap = max(1, min(cap, total))
    if total <= cap:
        return total
    for d in range(cap, 0, -1):
        if total % d == 0 and d % align == 0:
            return d
    return total  # single full block (always layout-legal)


# ----------------------------------------------------------------------------
# Pass 1: implicit-GEMM conv + per-channel sum / sum-of-squares accumulation.
# Grid = (N, OH_tiles); both axes "arbitrary" because the stats scratch is a
# sequential accumulator across the whole grid.
# ----------------------------------------------------------------------------
def conv_stats_kernel(xp_ref, w_ref, y_ref, sum_ref, ssq_ref, sum_acc, ssq_acc,
                      *, toh, ow, c, ocp, kh, kw, stride):
    b = pl.program_id(0)
    t = pl.program_id(1)

    @pl.when(jnp.logical_and(b == 0, t == 0))
    def _init():
        sum_acc[...] = jnp.zeros_like(sum_acc)
        ssq_acc[...] = jnp.zeros_like(ssq_acc)

    oh0 = t * toh  # first output row of this tile

    acc = jnp.zeros((toh * ow, ocp), jnp.float32)
    for idx in range(kh * kw):
        i, j = idx // kw, idx % kw
        if stride == 1:
            slab = xp_ref[0, pl.ds(oh0 + i, toh), :, :]          # (toh, WP, C)
            win = slab[:, j:j + ow, :]                            # (toh, OW, C)
        else:
            # TODO(synk): stride > 1 path (strided slicing) is best-effort;
            # the validated configuration uses stride == 1.
            span = (toh - 1) * stride + 1
            slab = xp_ref[0, pl.ds(oh0 * stride + i, span), :, :]
            win = slab[::stride, j:j + (ow - 1) * stride + 1:stride, :]
        acc = acc + jnp.dot(win.reshape(toh * ow, c), w_ref[idx],
                            preferred_element_type=jnp.float32)

    y_ref[...] = acc.reshape(1, toh, ow, ocp)
    sum_acc[...] += jnp.sum(acc, axis=0, keepdims=True)
    ssq_acc[...] += jnp.sum(acc * acc, axis=0, keepdims=True)

    @pl.when(jnp.logical_and(b == pl.num_programs(0) - 1,
                             t == pl.num_programs(1) - 1))
    def _finalize():
        sum_ref[...] = sum_acc[...]
        ssq_ref[...] = ssq_acc[...]


# ----------------------------------------------------------------------------
# Pass 2: normalize + ReLU over lane-dense (TILE_M, OC_pad) tiles ("parallel").
# ----------------------------------------------------------------------------
def bn_relu_kernel(y_ref, scale_ref, shift_ref, o_ref):
    o_ref[...] = jnp.maximum(y_ref[...] * scale_ref[...] + shift_ref[...], 0.0)


@functools.partial(
    jax.jit,
    static_argnames=("kernel_size", "padding", "stride",
                     "pass1_rows_hint", "pass2_rows_hint"))
def conv_module_forward(x, weight, bias, gamma, beta, *, kernel_size, padding,
                        stride, pass1_rows_hint=1024, pass2_rows_hint=1024):
    """Conv2d -> BatchNorm2d (batch stats) -> ReLU.  x: (N,C,H,W) -> (N,OC,OH,OW)."""
    # Conv bias is accepted for API parity with nn.Conv2d but is mathematically
    # cancelled by the training-mode BN mean subtraction, so it is not used.
    del bias

    n, c, h, w = x.shape
    oc = weight.shape[0]
    kh = kw = kernel_size
    oh = (h + 2 * padding - kh) // stride + 1
    ow = (w + 2 * padding - kw) // stride + 1
    hp, wp = h + 2 * padding, w + 2 * padding
    ocp = _round_up(oc, 128)  # lane-dense output channels

    # NCHW -> NHWC + spatial zero pad (single XLA pass over the input).
    x_nhwc = jnp.transpose(x, (0, 2, 3, 1))
    xp = jnp.pad(x_nhwc, ((0, 0), (padding, padding), (padding, padding), (0, 0)))

    # (OC, C, KH, KW) -> (KH*KW, C, OC_pad): one (C, OC_pad) tap matrix per offset.
    w_r = jnp.transpose(weight, (2, 3, 1, 0)).reshape(kh * kw, c, oc)
    w_r = jnp.pad(w_r, ((0, 0), (0, 0), (0, ocp - oc))).astype(jnp.float32)
    g_row = jnp.pad(gamma, (0, ocp - oc)).reshape(1, ocp).astype(jnp.float32)
    bt_row = jnp.pad(beta, (0, ocp - oc)).reshape(1, ocp).astype(jnp.float32)

    # --- Pass 1: conv (implicit GEMM) + batch-stat accumulation --------------
    toh = _pick_divisor(oh, max(1, pass1_rows_hint // max(ow, 1)))
    n_t = oh // toh

    kern1 = functools.partial(conv_stats_kernel, toh=toh, ow=ow, c=c, ocp=ocp,
                              kh=kh, kw=kw, stride=stride)
    y, csum, cssq = pl.pallas_call(
        kern1,
        grid=(n, n_t),
        in_specs=[
            # Full padded image per batch element; block index is constant
            # across the row-tile axis, so it is DMA'd once per image.
            pl.BlockSpec((1, hp, wp, c), lambda b, t: (b, 0, 0, 0)),
            pl.BlockSpec((kh * kw, c, ocp), lambda b, t: (0, 0, 0)),
        ],
        out_specs=[
            pl.BlockSpec((1, toh, ow, ocp), lambda b, t: (b, t, 0, 0)),
            pl.BlockSpec((1, ocp), lambda b, t: (0, 0)),
            pl.BlockSpec((1, ocp), lambda b, t: (0, 0)),
        ],
        out_shape=[
            jax.ShapeDtypeStruct((n, oh, ow, ocp), jnp.float32),
            jax.ShapeDtypeStruct((1, ocp), jnp.float32),
            jax.ShapeDtypeStruct((1, ocp), jnp.float32),
        ],
        scratch_shapes=[pltpu.VMEM((1, ocp), jnp.float32),
                        pltpu.VMEM((1, ocp), jnp.float32)],
        compiler_params=pltpu.CompilerParams(
            dimension_semantics=("arbitrary", "arbitrary"),
            vmem_limit_bytes=32 * 1024 * 1024),
    )(xp, w_r)

    # --- Finalize BN stats (tiny (1, OC_pad) math; done in XLA) --------------
    m_total = n * oh * ow
    mean = csum / float(m_total)
    var = jnp.maximum(cssq / float(m_total) - mean * mean, 0.0)
    inv_std = lax.rsqrt(var + BN_EPS)
    scale = g_row * inv_std
    shift = bt_row - mean * scale

    # --- Pass 2: tiled normalize + ReLU, M axis parallel ----------------------
    tile_m = _pick_row_tile(m_total, pass2_rows_hint)
    out_rows = pl.pallas_call(
        bn_relu_kernel,
        grid=(m_total // tile_m,),
        in_specs=[
            pl.BlockSpec((tile_m, ocp), lambda i: (i, 0)),
            pl.BlockSpec((1, ocp), lambda i: (0, 0)),
            pl.BlockSpec((1, ocp), lambda i: (0, 0)),
        ],
        out_specs=pl.BlockSpec((tile_m, ocp), lambda i: (i, 0)),
        out_shape=jax.ShapeDtypeStruct((m_total, ocp), jnp.float32),
        compiler_params=pltpu.CompilerParams(
            dimension_semantics=("parallel",),
            vmem_limit_bytes=32 * 1024 * 1024),
    )(y.reshape(m_total, ocp), scale, shift)

    # (M, OC_pad) -> (N, OH, OW, OC) -> NCHW (module contract is NCHW).
    out = out_rows.reshape(n, oh, ow, ocp)[..., :oc]
    return jnp.transpose(out, (0, 3, 1, 2))


def reference_forward(x, weight, bias, gamma, beta, *, padding, stride):
    """Pure-JAX reference: conv2d (with bias) -> BN(batch stats) -> ReLU, NCHW."""
    y = lax.conv_general_dilated(
        x, weight, window_strides=(stride, stride),
        padding=[(padding, padding), (padding, padding)],
        dimension_numbers=("NCHW", "OIHW", "NCHW"))
    y = y + bias.reshape(1, -1, 1, 1)
    mean = jnp.mean(y, axis=(0, 2, 3), keepdims=True)
    var = jnp.mean((y - mean) ** 2, axis=(0, 2, 3), keepdims=True)
    y = (y - mean) * lax.rsqrt(var + BN_EPS)
    y = y * gamma.reshape(1, -1, 1, 1) + beta.reshape(1, -1, 1, 1)
    return jnp.maximum(y, 0.0)


if __name__ == "__main__":
    # Conv(in=4, out=8, k=3, pad=1, stride=1) at small shapes.
    N, C, H, W = 2, 4, 16, 16
    OC, K = 8, 3
    PAD, STRIDE = 1, 1

    key = jax.random.PRNGKey(0)
    kx, kw_, kb = jax.random.split(key, 3)
    x = jax.random.normal(kx, (N, C, H, W), dtype=jnp.float32)
    weight = jax.random.normal(kw_, (OC, C, K, K), dtype=jnp.float32) * 0.1
    bias = jax.random.normal(kb, (OC,), dtype=jnp.float32) * 0.1
    gamma = jnp.ones((OC,), dtype=jnp.float32)   # BN weight init
    beta = jnp.zeros((OC,), dtype=jnp.float32)   # BN bias init

    ref = reference_forward(x, weight, bias, gamma, beta, padding=PAD, stride=STRIDE)

    # Default (production-sized) tiling.
    out = conv_module_forward(x, weight, bias, gamma, beta,
                              kernel_size=K, padding=PAD, stride=STRIDE)
    out = jax.block_until_ready(out)
    assert out.shape == (N, OC, H, W), out.shape
    assert jnp.allclose(out, ref, atol=1e-4, rtol=1e-4), \
        float(jnp.max(jnp.abs(out - ref)))

    # Small tiles: exercises multi-tile OH grid (dynamic row offsets) and the
    # multi-tile "parallel" normalize pass.
    out_small = conv_module_forward(x, weight, bias, gamma, beta,
                                    kernel_size=K, padding=PAD, stride=STRIDE,
                                    pass1_rows_hint=128, pass2_rows_hint=128)
    out_small = jax.block_until_ready(out_small)
    assert jnp.allclose(out_small, ref, atol=1e-4, rtol=1e-4), \
        float(jnp.max(jnp.abs(out_small - ref)))

    print("KERNEL_OK")
</pallas_src>

<mosaic_0001>
module attributes {stable_mosaic.version = 11 : i64} {
  func.func @conv_stats_kernel(%arg0: i32, %arg1: i32, %arg2: memref<1x18x18x4xf32, #tpu.memory_space<vmem>>, %arg3: memref<9x4x128xf32, #tpu.memory_space<vmem>>, %arg4: memref<1x16x16x128xf32, #tpu.memory_space<vmem>>, %arg5: memref<1x128xf32, #tpu.memory_space<vmem>>, %arg6: memref<1x128xf32, #tpu.memory_space<vmem>>, %arg7: memref<1x128xf32, #tpu.memory_space<vmem>>, %arg8: memref<1x128xf32, #tpu.memory_space<vmem>>) attributes {dimension_semantics = [#tpu.dimension_semantics<arbitrary>, #tpu.dimension_semantics<arbitrary>], iteration_bounds = array<i64: 2, 1>, scalar_prefetch = 0 : i64, scratch_operands = 2 : i64, tpu.core_type = #tpu.core_type<tc>, window_params = [{transform_indices = @transform_0, window_bounds = array<i64: 1, 18, 18, 4>}, {pipeline_mode = #tpu.pipeline_mode<synchronous>, transform_indices = @transform_1, window_bounds = array<i64: 9, 4, 128>}, {transform_indices = @transform_2, window_bounds = array<i64: 1, 16, 16, 128>}, {pipeline_mode = #tpu.pipeline_mode<synchronous>, transform_indices = @transform_3, window_bounds = array<i64: 1, 128>}, {pipeline_mode = #tpu.pipeline_mode<synchronous>, transform_indices = @transform_4, window_bounds = array<i64: 1, 128>}]} {
    %c0_i32 = arith.constant 0 : i32
    %0 = arith.cmpi eq, %arg0, %c0_i32 : i32
    %c0_i32_0 = arith.constant 0 : i32
    %1 = arith.cmpi eq, %arg1, %c0_i32_0 : i32
    %2 = arith.andi %0, %1 : i1
    %3 = arith.extui %2 : i1 to i32
    %c0_i32_1 = arith.constant 0 : i32
    %4 = arith.cmpi ne, %3, %c0_i32_1 : i32
    scf.if %4 {
      %cst_80 = arith.constant 0.000000e+00 : f32
      %115 = vector.broadcast %cst_80 : f32 to vector<1x128xf32>
      %c0_81 = arith.constant 0 : index
      %c0_82 = arith.constant 0 : index
      %116 = vector.load %arg7[%c0_81, %c0_82] : memref<1x128xf32, #tpu.memory_space<vmem>>, vector<1x128xf32>
      tpu.vector_store %arg7[%c0_81, %c0_82], %115 {strides = array<i32>} : memref<1x128xf32, #tpu.memory_space<vmem>>, vector<1x128xf32>,
      %cst_83 = arith.constant 0.000000e+00 : f32
      %117 = vector.broadcast %cst_83 : f32 to vector<1x128xf32>
      %c0_84 = arith.constant 0 : index
      %c0_85 = arith.constant 0 : index
      %118 = vector.load %arg8[%c0_84, %c0_85] : memref<1x128xf32, #tpu.memory_space<vmem>>, vector<1x128xf32>
      tpu.vector_store %arg8[%c0_84, %c0_85], %117 {strides = array<i32>} : memref<1x128xf32, #tpu.memory_space<vmem>>, vector<1x128xf32>,
    } else {
    }
    %c16_i32 = arith.constant 16 : i32
    %5 = arith.muli %arg1, %c16_i32 : i32
    %cst = arith.constant 0.000000e+00 : f32
    %6 = vector.broadcast %cst : f32 to vector<256x128xf32>
    %c0_i32_2 = arith.constant 0 : i32
    %7 = arith.addi %5, %c0_i32_2 : i32
    %c0 = arith.constant 0 : index
    %8 = arith.index_cast %7 : i32 to index
    %c0_3 = arith.constant 0 : index
    %c0_4 = arith.constant 0 : index
    %9 = vector.load %arg2[%c0, %8, %c0_3, %c0_4] : memref<1x18x18x4xf32, #tpu.memory_space<vmem>>, vector<1x16x18x4xf32>
    %10 = vector.shape_cast %9 : vector<1x16x18x4xf32> to vector<16x18x4xf32>
    %11 = vector.extract_strided_slice %10 {offsets = [0, 0, 0], sizes = [16, 16, 4], strides = [1, 1, 1]} : vector<16x18x4xf32> to vector<16x16x4xf32>
    %12 = vector.shape_cast %11 : vector<16x16x4xf32> to vector<256x4xf32>
    %c0_5 = arith.constant 0 : index
    %c0_6 = arith.constant 0 : index
    %c0_7 = arith.constant 0 : index
    %13 = vector.load %arg3[%c0_5, %c0_6, %c0_7] : memref<9x4x128xf32, #tpu.memory_space<vmem>>, vector<1x4x128xf32>
    %14 = vector.shape_cast %13 : vector<1x4x128xf32> to vector<4x128xf32>
    %cst_8 = arith.constant dense<0.000000e+00> : vector<256x128xf32>
    %15 = tpu.matmul %12, %14, %cst_8 {dimension_numbers = #tpu.dot_dimension_numbers<[1], [0], [0], [1], [0, 0, 1, 1], [], []>} : vector<256x4xf32>, vector<4x128xf32>, vector<256x128xf32> -> vector<256x128xf32>
    %16 = arith.addf %6, %15 : vector<256x128xf32>
    %c0_i32_9 = arith.constant 0 : i32
    %17 = arith.addi %5, %c0_i32_9 : i32
    %c0_10 = arith.constant 0 : index
    %18 = arith.index_cast %17 : i32 to index
    %c0_11 = arith.constant 0 : index
    %c0_12 = arith.constant 0 : index
    %19 = vector.load %arg2[%c0_10, %18, %c0_11, %c0_12] : memref<1x18x18x4xf32, #tpu.memory_space<vmem>>, vector<1x16x18x4xf32>
    %20 = vector.shape_cast %19 : vector<1x16x18x4xf32> to vector<16x18x4xf32>
    %21 = vector.extract_strided_slice %20 {offsets = [0, 1, 0], sizes = [16, 16, 4], strides = [1, 1, 1]} : vector<16x18x4xf32> to vector<16x16x4xf32>
    %22 = vector.shape_cast %21 : vector<16x16x4xf32> to vector<256x4xf32>
    %c1 = arith.constant 1 : index
    %c0_13 = arith.constant 0 : index
    %c0_14 = arith.constant 0 : index
    %23 = vector.load %arg3[%c1, %c0_13, %c0_14] : memref<9x4x128xf32, #tpu.memory_space<vmem>>, vector<1x4x128xf32>
    %24 = vector.shape_cast %23 : vector<1x4x128xf32> to vector<4x128xf32>
    %cst_15 = arith.constant dense<0.000000e+00> : vector<256x128xf32>
    %25 = tpu.matmul %22, %24, %cst_15 {dimension_numbers = #tpu.dot_dimension_numbers<[1], [0], [0], [1], [0, 0, 1, 1], [], []>} : vector<256x4xf32>, vector<4x128xf32>, vector<256x128xf32> -> vector<256x128xf32>
    %26 = arith.addf %16, %25 : vector<256x128xf32>
    %c0_i32_16 = arith.constant 0 : i32
    %27 = arith.addi %5, %c0_i32_16 : i32
    %c0_17 = arith.constant 0 : index
    %28 = arith.index_cast %27 : i32 to index
    %c0_18 = arith.constant 0 : index
    %c0_19 = arith.constant 0 : index
    %29 = vector.load %arg2[%c0_17, %28, %c0_18, %c0_19] : memref<1x18x18x4xf32, #tpu.memory_space<vmem>>, vector<1x16x18x4xf32>
    %30 = vector.shape_cast %29 : vector<1x16x18x4xf32> to vector<16x18x4xf32>
    %31 = vector.extract_strided_slice %30 {offsets = [0, 2, 0], sizes = [16, 16, 4], strides = [1, 1, 1]} : vector<16x18x4xf32> to vector<16x16x4xf32>
    %32 = vector.shape_cast %31 : vector<16x16x4xf32> to vector<256x4xf32>
    %c2 = arith.constant 2 : index
    %c0_20 = arith.constant 0 : index
    %c0_21 = arith.constant 0 : index
    %33 = vector.load %arg3[%c2, %c0_20, %c0_21] : memref<9x4x128xf32, #tpu.memory_space<vmem>>, vector<1x4x128xf32>
    %34 = vector.shape_cast %33 : vector<1x4x128xf32> to vector<4x128xf32>
    %cst_22 = arith.constant dense<0.000000e+00> : vector<256x128xf32>
    %35 = tpu.matmul %32, %34, %cst_22 {dimension_numbers = #tpu.dot_dimension_numbers<[1], [0], [0], [1], [0, 0, 1, 1], [], []>} : vector<256x4xf32>, vector<4x128xf32>, vector<256x128xf32> -> vector<256x128xf32>
    %36 = arith.addf %26, %35 : vector<256x128xf32>
    %c1_i32 = arith.constant 1 : i32
    %37 = arith.addi %5, %c1_i32 : i32
    %c0_23 = arith.constant 0 : index
    %38 = arith.index_cast %37 : i32 to index
    %c0_24 = arith.constant 0 : index
    %c0_25 = arith.constant 0 : index
    %39 = vector.load %arg2[%c0_23, %38, %c0_24, %c0_25] : memref<1x18x18x4xf32, #tpu.memory_space<vmem>>, vector<1x16x18x4xf32>
    %40 = vector.shape_cast %39 : vector<1x16x18x4xf32> to vector<16x18x4xf32>
    %41 = vector.extract_strided_slice %40 {offsets = [0, 0, 0], sizes = [16, 16, 4], strides = [1, 1, 1]} : vector<16x18x4xf32> to vector<16x16x4xf32>
    %42 = vector.shape_cast %41 : vector<16x16x4xf32> to vector<256x4xf32>
    %c3 = arith.constant 3 : index
    %c0_26 = arith.constant 0 : index
    %c0_27 = arith.constant 0 : index
    %43 = vector.load %arg3[%c3, %c0_26, %c0_27] : memref<9x4x128xf32, #tpu.memory_space<vmem>>, vector<1x4x128xf32>
    %44 = vector.shape_cast %43 : vector<1x4x128xf32> to vector<4x128xf32>
    %cst_28 = arith.constant dense<0.000000e+00> : vector<256x128xf32>
    %45 = tpu.matmul %42, %44, %cst_28 {dimension_numbers = #tpu.dot_dimension_numbers<[1], [0], [0], [1], [0, 0, 1, 1], [], []>} : vector<256x4xf32>, vector<4x128xf32>, vector<256x128xf32> -> vector<256x128xf32>
    %46 = arith.addf %36, %45 : vector<256x128xf32>
    %c1_i32_29 = arith.constant 1 : i32
    %47 = arith.addi %5, %c1_i32_29 : i32
    %c0_30 = arith.constant 0 : index
    %48 = arith.index_cast %47 : i32 to index
    %c0_31 = arith.constant 0 : index
    %c0_32 = arith.constant 0 : index
    %49 = vector.load %arg2[%c0_30, %48, %c0_31, %c0_32] : memref<1x18x18x4xf32, #tpu.memory_space<vmem>>, vector<1x16x18x4xf32>
    %50 = vector.shape_cast %49 : vector<1x16x18x4xf32> to vector<16x18x4xf32>
    %51 = vector.extract_strided_slice %50 {offsets = [0, 1, 0], sizes = [16, 16, 4], strides = [1, 1, 1]} : vector<16x18x4xf32> to vector<16x16x4xf32>
    %52 = vector.shape_cast %51 : vector<16x16x4xf32> to vector<256x4xf32>
    %c4 = arith.constant 4 : index
    %c0_33 = arith.constant 0 : index
    %c0_34 = arith.constant 0 : index
    %53 = vector.load %arg3[%c4, %c0_33, %c0_34] : memref<9x4x128xf32, #tpu.memory_space<vmem>>, vector<1x4x128xf32>
    %54 = vector.shape_cast %53 : vector<1x4x128xf32> to vector<4x128xf32>
    %cst_35 = arith.constant dense<0.000000e+00> : vector<256x128xf32>
    %55 = tpu.matmul %52, %54, %cst_35 {dimension_numbers = #tpu.dot_dimension_numbers<[1], [0], [0], [1], [0, 0, 1, 1], [], []>} : vector<256x4xf32>, vector<4x128xf32>, vector<256x128xf32> -> vector<256x128xf32>
    %56 = arith.addf %46, %55 : vector<256x128xf32>
    %c1_i32_36 = arith.constant 1 : i32
    %57 = arith.addi %5, %c1_i32_36 : i32
    %c0_37 = arith.constant 0 : index
    %58 = arith.index_cast %57 : i32 to index
    %c0_38 = arith.constant 0 : index
    %c0_39 = arith.constant 0 : index
    %59 = vector.load %arg2[%c0_37, %58, %c0_38, %c0_39] : memref<1x18x18x4xf32, #tpu.memory_space<vmem>>, vector<1x16x18x4xf32>
    %60 = vector.shape_cast %59 : vector<1x16x18x4xf32> to vector<16x18x4xf32>
    %61 = vector.extract_strided_slice %60 {offsets = [0, 2, 0], sizes = [16, 16, 4], strides = [1, 1, 1]} : vector<16x18x4xf32> to vector<16x16x4xf32>
    %62 = vector.shape_cast %61 : vector<16x16x4xf32> to vector<256x4xf32>
    %c5 = arith.constant 5 : index
    %c0_40 = arith.constant 0 : index
    %c0_41 = arith.constant 0 : index
    %63 = vector.load %arg3[%c5, %c0_40, %c0_41] : memref<9x4x128xf32, #tpu.memory_space<vmem>>, vector<1x4x128xf32>
    %64 = vector.shape_cast %63 : vector<1x4x128xf32> to vector<4x128xf32>
    %cst_42 = arith.constant dense<0.000000e+00> : vector<256x128xf32>
    %65 = tpu.matmul %62, %64, %cst_42 {dimension_numbers = #tpu.dot_dimension_numbers<[1], [0], [0], [1], [0, 0, 1, 1], [], []>} : vector<256x4xf32>, vector<4x128xf32>, vector<256x128xf32> -> vector<256x128xf32>
    %66 = arith.addf %56, %65 : vector<256x128xf32>
    %c2_i32 = arith.constant 2 : i32
    %67 = arith.addi %5, %c2_i32 : i32
    %c0_43 = arith.constant 0 : index
    %68 = arith.index_cast %67 : i32 to index
    %c0_44 = arith.constant 0 : index
    %c0_45 = arith.constant 0 : index
    %69 = vector.load %arg2[%c0_43, %68, %c0_44, %c0_45] : memref<1x18x18x4xf32, #tpu.memory_space<vmem>>, vector<1x16x18x4xf32>
    %70 = vector.shape_cast %69 : vector<1x16x18x4xf32> to vector<16x18x4xf32>
    %71 = vector.extract_strided_slice %70 {offsets = [0, 0, 0], sizes = [16, 16, 4], strides = [1, 1, 1]} : vector<16x18x4xf32> to vector<16x16x4xf32>
    %72 = vector.shape_cast %71 : vector<16x16x4xf32> to vector<256x4xf32>
    %c6 = arith.constant 6 : index
    %c0_46 = arith.constant 0 : index
    %c0_47 = arith.constant 0 : index
    %73 = vector.load %arg3[%c6, %c0_46, %c0_47] : memref<9x4x128xf32, #tpu.memory_space<vmem>>, vector<1x4x128xf32>
    %74 = vector.shape_cast %73 : vector<1x4x128xf32> to vector<4x128xf32>
    %cst_48 = arith.constant dense<0.000000e+00> : vector<256x128xf32>
    %75 = tpu.matmul %72, %74, %cst_48 {dimension_numbers = #tpu.dot_dimension_numbers<[1], [0], [0], [1], [0, 0, 1, 1], [], []>} : vector<256x4xf32>, vector<4x128xf32>, vector<256x128xf32> -> vector<256x128xf32>
    %76 = arith.addf %66, %75 : vector<256x128xf32>
    %c2_i32_49 = arith.constant 2 : i32
    %77 = arith.addi %5, %c2_i32_49 : i32
    %c0_50 = arith.constant 0 : index
    %78 = arith.index_cast %77 : i32 to index
    %c0_51 = arith.constant 0 : index
    %c0_52 = arith.constant 0 : index
    %79 = vector.load %arg2[%c0_50, %78, %c0_51, %c0_52] : memref<1x18x18x4xf32, #tpu.memory_space<vmem>>, vector<1x16x18x4xf32>
    %80 = vector.shape_cast %79 : vector<1x16x18x4xf32> to vector<16x18x4xf32>
    %81 = vector.extract_strided_slice %80 {offsets = [0, 1, 0], sizes = [16, 16, 4], strides = [1, 1, 1]} : vector<16x18x4xf32> to vector<16x16x4xf32>
    %82 = vector.shape_cast %81 : vector<16x16x4xf32> to vector<256x4xf32>
    %c7 = arith.constant 7 : index
    %c0_53 = arith.constant 0 : index
    %c0_54 = arith.constant 0 : index
    %83 = vector.load %arg3[%c7, %c0_53, %c0_54] : memref<9x4x128xf32, #tpu.memory_space<vmem>>, vector<1x4x128xf32>
    %84 = vector.shape_cast %83 : vector<1x4x128xf32> to vector<4x128xf32>
    %cst_55 = arith.constant dense<0.000000e+00> : vector<256x128xf32>
    %85 = tpu.matmul %82, %84, %cst_55 {dimension_numbers = #tpu.dot_dimension_numbers<[1], [0], [0], [1], [0, 0, 1, 1], [], []>} : vector<256x4xf32>, vector<4x128xf32>, vector<256x128xf32> -> vector<256x128xf32>
    %86 = arith.addf %76, %85 : vector<256x128xf32>
    %c2_i32_56 = arith.constant 2 : i32
    %87 = arith.addi %5, %c2_i32_56 : i32
    %c0_57 = arith.constant 0 : index
    %88 = arith.index_cast %87 : i32 to index
    %c0_58 = arith.constant 0 : index
    %c0_59 = arith.constant 0 : index
    %89 = vector.load %arg2[%c0_57, %88, %c0_58, %c0_59] : memref<1x18x18x4xf32, #tpu.memory_space<vmem>>, vector<1x16x18x4xf32>
    %90 = vector.shape_cast %89 : vector<1x16x18x4xf32> to vector<16x18x4xf32>
    %91 = vector.extract_strided_slice %90 {offsets = [0, 2, 0], sizes = [16, 16, 4], strides = [1, 1, 1]} : vector<16x18x4xf32> to vector<16x16x4xf32>
    %92 = vector.shape_cast %91 : vector<16x16x4xf32> to vector<256x4xf32>
    %c8 = arith.constant 8 : index
    %c0_60 = arith.constant 0 : index
    %c0_61 = arith.constant 0 : index
    %93 = vector.load %arg3[%c8, %c0_60, %c0_61] : memref<9x4x128xf32, #tpu.memory_space<vmem>>, vector<1x4x128xf32>
    %94 = vector.shape_cast %93 : vector<1x4x128xf32> to vector<4x128xf32>
    %cst_62 = arith.constant dense<0.000000e+00> : vector<256x128xf32>
    %95 = tpu.matmul %92, %94, %cst_62 {dimension_numbers = #tpu.dot_dimension_numbers<[1], [0], [0], [1], [0, 0, 1, 1], [], []>} : vector<256x4xf32>, vector<4x128xf32>, vector<256x128xf32> -> vector<256x128xf32>
    %96 = arith.addf %86, %95 : vector<256x128xf32>
    %97 = vector.shape_cast %96 : vector<256x128xf32> to vector<1x16x16x128xf32>
    %c0_63 = arith.constant 0 : index
    %c0_64 = arith.constant 0 : index
    %c0_65 = arith.constant 0 : index
    %c0_66 = arith.constant 0 : index
    %98 = vector.load %arg4[%c0_63, %c0_64, %c0_65, %c0_66] : memref<1x16x16x128xf32, #tpu.memory_space<vmem>>, vector<1x16x16x128xf32>
    tpu.vector_store %arg4[%c0_63, %c0_64, %c0_65, %c0_66], %97 {strides = array<i32>} : memref<1x16x16x128xf32, #tpu.memory_space<vmem>>, vector<1x16x16x128xf32>,
    %c0_67 = arith.constant 0 : index
    %c0_68 = arith.constant 0 : index
    %99 = vector.load %arg7[%c0_67, %c0_68] : memref<1x128xf32, #tpu.memory_space<vmem>>, vector<1x128xf32>
    %cst_69 = arith.constant dense<0.000000e+00> : vector<128xf32>
    %100 = vector.multi_reduction <add>, %96, %cst_69 [0] : vector<256x128xf32> to vector<128xf32>
    %101 = vector.shape_cast %100 : vector<128xf32> to vector<1x128xf32>
    %102 = arith.addf %99, %101 : vector<1x128xf32>
    %c0_70 = arith.constant 0 : index
    %c0_71 = arith.constant 0 : index
    %103 = vector.load %arg7[%c0_70, %c0_71] : memref<1x128xf32, #tpu.memory_space<vmem>>, vector<1x128xf32>
    tpu.vector_store %arg7[%c0_70, %c0_71], %102 {strides = array<i32>} : memref<1x128xf32, #tpu.memory_space<vmem>>, vector<1x128xf32>,
    %c0_72 = arith.constant 0 : index
    %c0_73 = arith.constant 0 : index
    %104 = vector.load %arg8[%c0_72, %c0_73] : memref<1x128xf32, #tpu.memory_space<vmem>>, vector<1x128xf32>
    %105 = arith.mulf %96, %96 : vector<256x128xf32>
    %cst_74 = arith.constant dense<0.000000e+00> : vector<128xf32>
    %106 = vector.multi_reduction <add>, %105, %cst_74 [0] : vector<256x128xf32> to vector<128xf32>
    %107 = vector.shape_cast %106 : vector<128xf32> to vector<1x128xf32>
    %108 = arith.addf %104, %107 : vector<1x128xf32>
    %c0_75 = arith.constant 0 : index
    %c0_76 = arith.constant 0 : index
    %109 = vector.load %arg8[%c0_75, %c0_76] : memref<1x128xf32, #tpu.memory_space<vmem>>, vector<1x128xf32>
    tpu.vector_store %arg8[%c0_75, %c0_76], %108 {strides = array<i32>} : memref<1x128xf32, #tpu.memory_space<vmem>>, vector<1x128xf32>,
    %c1_i32_77 = arith.constant 1 : i32
    %110 = arith.cmpi eq, %arg0, %c1_i32_77 : i32
    %c0_i32_78 = arith.constant 0 : i32
    %111 = arith.cmpi eq, %arg1, %c0_i32_78 : i32
    %112 = arith.andi %110, %111 : i1
    %113 = arith.extui %112 : i1 to i32
    %c0_i32_79 = arith.constant 0 : i32
    %114 = arith.cmpi ne, %113, %c0_i32_79 : i32
    scf.if %114 {
      %c0_80 = arith.constant 0 : index
      %c0_81 = arith.constant 0 : index
      %115 = vector.load %arg7[%c0_80, %c0_81] : memref<1x128xf32, #tpu.memory_space<vmem>>, vector<1x128xf32>
      %c0_82 = arith.constant 0 : index
      %c0_83 = arith.constant 0 : index
      %116 = vector.load %arg5[%c0_82, %c0_83] : memref<1x128xf32, #tpu.memory_space<vmem>>, vector<1x128xf32>
      tpu.vector_store %arg5[%c0_82, %c0_83], %115 {strides = array<i32>} : memref<1x128xf32, #tpu.memory_space<vmem>>, vector<1x128xf32>,
      %c0_84 = arith.constant 0 : index
      %c0_85 = arith.constant 0 : index
      %117 = vector.load %arg8[%c0_84, %c0_85] : memref<1x128xf32, #tpu.memory_space<vmem>>, vector<1x128xf32>
      %c0_86 = arith.constant 0 : index
      %c0_87 = arith.constant 0 : index
      %118 = vector.load %arg6[%c0_86, %c0_87] : memref<1x128xf32, #tpu.memory_space<vmem>>, vector<1x128xf32>
      tpu.vector_store %arg6[%c0_86, %c0_87], %117 {strides = array<i32>} : memref<1x128xf32, #tpu.memory_space<vmem>>, vector<1x128xf32>,
    } else {
    }
    return
  }
  func.func @transform_0(%arg0: i32, %arg1: i32) -> (i32, i32, i32, i32) {
    %c0_i32 = arith.constant 0 : i32
    %c0_i32_0 = arith.constant 0 : i32
    %c0_i32_1 = arith.constant 0 : i32
    %c0_i32_2 = arith.constant 0 : i32
    return %arg0, %c0_i32, %c0_i32_0, %c0_i32_1 : i32, i32, i32, i32
  }
  func.func @transform_1(%arg0: i32, %arg1: i32) -> (i32, i32, i32) {
    %c0_i32 = arith.constant 0 : i32
    %c0_i32_0 = arith.constant 0 : i32
    %c0_i32_1 = arith.constant 0 : i32
    %c0_i32_2 = arith.constant 0 : i32
    return %c0_i32, %c0_i32_0, %c0_i32_1 : i32, i32, i32
  }
  func.func @transform_2(%arg0: i32, %arg1: i32) -> (i32, i32, i32, i32) {
    %c0_i32 = arith.constant 0 : i32
    %c0_i32_0 = arith.constant 0 : i32
    %c0_i32_1 = arith.constant 0 : i32
    return %arg0, %arg1, %c0_i32, %c0_i32_0 : i32, i32, i32, i32
  }
  func.func @transform_3(%arg0: i32, %arg1: i32) -> (i32, i32) {
    %c0_i32 = arith.constant 0 : i32
    %c0_i32_0 = arith.constant 0 : i32
    %c0_i32_1 = arith.constant 0 : i32
    return %c0_i32, %c0_i32_0 : i32, i32
  }
  func.func @transform_4(%arg0: i32, %arg1: i32) -> (i32, i32) {
    %c0_i32 = arith.constant 0 : i32
    %c0_i32_0 = arith.constant 0 : i32
    %c0_i32_1 = arith.constant 0 : i32
    return %c0_i32, %c0_i32_0 : i32, i32
  }
}

module attributes {stable_mosaic.version = 11 : i64} {
  func.func @bn_relu_kernel(%arg0: i32, %arg1: memref<512x128xf32, #tpu.memory_space<vmem>>, %arg2: memref<1x128xf32, #tpu.memory_space<vmem>>, %arg3: memref<1x128xf32, #tpu.memory_space<vmem>>, %arg4: memref<512x128xf32, #tpu.memory_space<vmem>>) attributes {dimension_semantics = [#tpu.dimension_semantics<parallel>], iteration_bounds = array<i64: 1>, scalar_prefetch = 0 : i64, scratch_operands = 0 : i64, tpu.core_type = #tpu.core_type<tc>, window_params = [{transform_indices = @transform_0, window_bounds = array<i64: 512, 128>}, {pipeline_mode = #tpu.pipeline_mode<synchronous>, transform_indices = @transform_1, window_bounds = array<i64: 1, 128>}, {pipeline_mode = #tpu.pipeline_mode<synchronous>, transform_indices = @transform_2, window_bounds = array<i64: 1, 128>}, {transform_indices = @transform_3, window_bounds = array<i64: 512, 128>}]} {
    %c0 = arith.constant 0 : index
    %c0_0 = arith.constant 0 : index
    %0 = vector.load %arg1[%c0, %c0_0] : memref<512x128xf32, #tpu.memory_space<vmem>>, vector<512x128xf32>
    %c0_1 = arith.constant 0 : index
    %c0_2 = arith.constant 0 : index
    %1 = vector.load %arg2[%c0_1, %c0_2] : memref<1x128xf32, #tpu.memory_space<vmem>>, vector<1x128xf32>
    %2 = vector.broadcast %1 : vector<1x128xf32> to vector<512x128xf32>
    %3 = arith.mulf %0, %2 : vector<512x128xf32>
    %c0_3 = arith.constant 0 : index
    %c0_4 = arith.constant 0 : index
    %4 = vector.load %arg3[%c0_3, %c0_4] : memref<1x128xf32, #tpu.memory_space<vmem>>, vector<1x128xf32>
    %5 = vector.broadcast %4 : vector<1x128xf32> to vector<512x128xf32>
    %6 = arith.addf %3, %5 : vector<512x128xf32>
    %cst = arith.constant 0.000000e+00 : f32
    %7 = vector.broadcast %cst : f32 to vector<512x128xf32>
    %8 = arith.maximumf %6, %7 : vector<512x128xf32>
    %c0_5 = arith.constant 0 : index
    %c0_6 = arith.constant 0 : index
    %9 = vector.load %arg4[%c0_5, %c0_6] : memref<512x128xf32, #tpu.memory_space<vmem>>, vector<512x128xf32>
    tpu.vector_store %arg4[%c0_5, %c0_6], %8 {strides = array<i32>} : memref<512x128xf32, #tpu.memory_space<vmem>>, vector<512x128xf32>,
    return
  }
  func.func @transform_0(%arg0: i32) -> (i32, i32) {
    %c0_i32 = arith.constant 0 : i32
    %c0_i32_0 = arith.constant 0 : i32
    return %arg0, %c0_i32 : i32, i32
  }
  func.func @transform_1(%arg0: i32) -> (i32, i32) {
    %c0_i32 = arith.constant 0 : i32
    %c0_i32_0 = arith.constant 0 : i32
    %c0_i32_1 = arith.constant 0 : i32
    return %c0_i32, %c0_i32_0 : i32, i32
  }
  func.func @transform_2(%arg0: i32) -> (i32, i32) {
    %c0_i32 = arith.constant 0 : i32
    %c0_i32_0 = arith.constant 0 : i32
    %c0_i32_1 = arith.constant 0 : i32
    return %c0_i32, %c0_i32_0 : i32, i32
  }
  func.func @transform_3(%arg0: i32) -> (i32, i32) {
    %c0_i32 = arith.constant 0 : i32
    %c0_i32_0 = arith.constant 0 : i32
    return %arg0, %c0_i32 : i32, i32
  }
}

</mosaic_0001>

<bundles_post_ra>
// kernel: conv_module_forward.3
= control target key start
LH: loop header
LB: loop body
LE: loop exit
PB: predicated region body
PF: predicated region fallthrough
CT: control target
= control target key end

     0   :  { %s896_s0 = inlined_call_operand.vmem [shape: f32[512,128], index: 0, kind: input, shape index: {}]   ;;  %s897_s1 = inlined_call_operand.vmem [shape: f32[1,128], index: 1, kind: input, shape index: {}]   ;;  %s898_s2 = inlined_call_operand.vmem [shape: f32[1,128], index: 2, kind: input, shape index: {}]   ;;  %s899_s3 = inlined_call_operand.vmem [shape: f32[512,128], index: 3, kind: output, shape index: {}]  }
   0x1   :  { %v14_v0 = vld [vmem:[%s896_s0] sm:$0xff]  ;;  %v15_v4 = vld [vmem:[%s896_s0 + $0x8] sm:$0xff]  ;;  %v16_v5 = vld [vmem:[%s896_s0 + $0x10] sm:$0xff] }
   0x2   :  { %v380_v1 = vld [vmem:[%s897_s1] ss:$0 sm:$0xff]  ;;  %v17_v6 = vld [vmem:[%s896_s0 + $0x18] sm:$0xff]  ;;  %v19_v11 = vld [vmem:[%s896_s0 + $0x28] sm:$0xff] }
   0x3   :  { %v385_v2 = vld [vmem:[%s898_s2] ss:$0 sm:$0xff]  ;;  %v85_v3 = vmul.f32 %v380_v1, %v14_v0  ;;  %v86_v7 = vmul.f32 %v380_v1, %v15_v4  ;;  %v87_v8 = vmul.f32 %v380_v1, %v16_v5  ;;  %v88_v9 = vmul.f32 %v380_v1, %v17_v6  ;;  %v20_v12 = vld [vmem:[%s896_s0 + $0x30] sm:$0xff]  ;;  %v21_v17 = vld [vmem:[%s896_s0 + $0x38] sm:$0xff] }
   0x4   :  { %v18_v10 = vld [vmem:[%s896_s0 + $0x20] sm:$0xff]  ;;  %v90_v15 = vmul.f32 %v380_v1, %v19_v11  ;;  %v91_v16 = vmul.f32 %v380_v1, %v20_v12  ;;  %v92_v21 = vmul.f32 %v380_v1, %v21_v17  ;;  %v23_v27 = vld [vmem:[%s896_s0 + $0x48] sm:$0xff]  ;;  %v24_v28 = vld [vmem:[%s896_s0 + $0x50] sm:$0xff] }
   0x5   :  { %v156_v13 = vadd.f32 %v385_v2, %v85_v3  ;;  %v89_v14 = vmul.f32 %v380_v1, %v18_v10  ;;  %v157_v18 = vadd.f32 %v385_v2, %v86_v7  ;;  %v158_v19 = vadd.f32 %v385_v2, %v87_v8  ;;  %v22_v22 = vld [vmem:[%s896_s0 + $0x40] sm:$0xff]  ;;  %v25_v29 = vld [vmem:[%s896_s0 + $0x58] sm:$0xff]  ;;  %v27_v35 = vld [vmem:[%s896_s0 + $0x68] sm:$0xff] }
   0x6   :  { %v159_v20 = vadd.f32 %v385_v2, %v88_v9  ;;  %v161_v25 = vadd.f32 %v385_v2, %v90_v15  ;;  %v162_v26 = vadd.f32 %v385_v2, %v91_v16  ;;  %v163_v33 = vadd.f32 %v385_v2, %v92_v21  ;;  %v26_v34 = vld [vmem:[%s896_s0 + $0x60] sm:$0xff]  ;;  %v28_v36 = vld [vmem:[%s896_s0 + $0x70] sm:$0xff]  ;;  %v29_v41 = vld [vmem:[%s896_s0 + $0x78] sm:$0xff] }
   0x7   :  { %v220_v23 = vmax.f32 %v156_v13, 0.0  ;;  %v160_v24 = vadd.f32 %v385_v2, %v89_v14  ;;  %v221_v30 = vmax.f32 %v157_v18, 0.0  ;;  %v222_v31 = vmax.f32 %v158_v19, 0.0  ;;  %v30_v54 = vld [vmem:[%s896_s0 + $0x80] sm:$0xff]  ;;  %v31_v59 = vld [vmem:[%s896_s0 + $0x88] sm:$0xff]  ;;  %v32_v60 = vld [vmem:[%s896_s0 + $0x90] sm:$0xff] }
   0x8   :  { %v223_v32 = vmax.f32 %v159_v20, 0.0  ;;  %v225_v38 = vmax.f32 %v161_v25, 0.0  ;;  %v226_v39 = vmax.f32 %v162_v26, 0.0  ;;  %v93_v40 = vmul.f32 %v380_v1, %v22_v22  ;;  %v33_v61 = vld [vmem:[%s896_s0 + $0x98] sm:$0xff]  ;;  %v34_v4 = vld [vmem:[%s896_s0 + $0xa0] sm:$0xff]  ;;  %v35_v5 = vld [vmem:[%s896_s0 + $0xa8] sm:$0xff] }
   0x9   :  { %284 = vst [vmem:[%s899_s3] sm:$0xff] %v220_v23  ;;  %v224_v37 = vmax.f32 %v160_v24, 0.0  ;;  %285 = vst [vmem:[%s899_s3 + $0x8] sm:$0xff] %v221_v30  ;;  %v227_v42 = vmax.f32 %v163_v33, 0.0  ;;  %v94_v43 = vmul.f32 %v380_v1, %v23_v27  ;;  %v95_v44 = vmul.f32 %v380_v1, %v24_v28  ;;  %v36_v6 = vld [vmem:[%s896_s0 + $0xb0] sm:$0xff]  ;;  %v37_v11 = vld [vmem:[%s896_s0 + $0xb8] sm:$0xff] }
   0xa   :  { %286 = vst [vmem:[%s899_s3 + $0x10] sm:$0xff] %v222_v31  ;;  %287 = vst [vmem:[%s899_s3 + $0x18] sm:$0xff] %v223_v32  ;;  %v96_v45 = vmul.f32 %v380_v1, %v25_v29  ;;  %v164_v46 = vadd.f32 %v385_v2, %v93_v40  ;;  %v97_v47 = vmul.f32 %v380_v1, %v26_v34  ;;  %v38_v24 = vld [vmem:[%s896_s0 + $0xc0] sm:$0xff]  ;;  %v39_v29 = vld [vmem:[%s896_s0 + $0xc8] sm:$0xff] }
   0xb   :  { %288 = vst [vmem:[%s899_s3 + $0x20] sm:$0xff] %v224_v37  ;;  %289 = vst [vmem:[%s899_s3 + $0x28] sm:$0xff] %v225_v38  ;;  %v98_v48 = vmul.f32 %v380_v1, %v27_v35  ;;  %v99_v49 = vmul.f32 %v380_v1, %v28_v36  ;;  %v165_v50 = vadd.f32 %v385_v2, %v94_v43  ;;  %v40_v30 = vld [vmem:[%s896_s0 + $0xd0] sm:$0xff]  ;;  %v41_v31 = vld [vmem:[%s896_s0 + $0xd8] sm:$0xff] }
   0xc   :  { %290 = vst [vmem:[%s899_s3 + $0x30] sm:$0xff] %v226_v39  ;;  %291 = vst [vmem:[%s899_s3 + $0x38] sm:$0xff] %v227_v42  ;;  %v166_v51 = vadd.f32 %v385_v2, %v95_v44  ;;  %v167_v52 = vadd.f32 %v385_v2, %v96_v45  ;;  %v100_v53 = vmul.f32 %v380_v1, %v29_v41  ;;  %v228_v55 = vmax.f32 %v164_v46, 0.0  ;;  %v42_v36 = vld [vmem:[%s896_s0 + $0xe0] sm:$0xff]  ;;  %v43_v37 = vld [vmem:[%s896_s0 + $0xe8] sm:$0xff] }
   0xd   :  { %v168_v56 = vadd.f32 %v385_v2, %v97_v47  ;;  %v169_v57 = vadd.f32 %v385_v2, %v98_v48  ;;  %v170_v58 = vadd.f32 %v385_v2, %v99_v49  ;;  %v229_v62 = vmax.f32 %v165_v50, 0.0  ;;  %v44_v38 = vld [vmem:[%s896_s0 + $0xf0] sm:$0xff]  ;;  %v45_v43 = vld [vmem:[%s896_s0 + $0xf8] sm:$0xff] }
   0xe   :  { %v230_v63 = vmax.f32 %v166_v51, 0.0  ;;  %v231_v0 = vmax.f32 %v167_v52, 0.0  ;;  %v171_v3 = vadd.f32 %v385_v2, %v100_v53  ;;  %292 = vst [vmem:[%s899_s3 + $0x40] sm:$0xff] %v228_v55  ;;  %v101_v10 = vmul.f32 %v380_v1, %v30_v54 }
   0xf   :  { %v232_v7 = vmax.f32 %v168_v56, 0.0  ;;  %v233_v8 = vmax.f32 %v169_v57, 0.0  ;;  %v234_v9 = vmax.f32 %v170_v58, 0.0  ;;  %293 = vst [vmem:[%s899_s3 + $0x48] sm:$0xff] %v229_v62  ;;  %v102_v13 = vmul.f32 %v380_v1, %v31_v59  ;;  %v46_v56 = vld [vmem:[%s896_s0 + $0x100] sm:$0xff]  ;;  %v48_v62 = vld [vmem:[%s896_s0 + $0x110] sm:$0xff] }
  0x10   :  { %294 = vst [vmem:[%s899_s3 + $0x50] sm:$0xff] %v230_v63  ;;  %295 = vst [vmem:[%s899_s3 + $0x58] sm:$0xff] %v231_v0  ;;  %v235_v12 = vmax.f32 %v171_v3, 0.0  ;;  %v103_v14 = vmul.f32 %v380_v1, %v32_v60  ;;  %v104_v15 = vmul.f32 %v380_v1, %v33_v61  ;;  %v172_v16 = vadd.f32 %v385_v2, %v101_v10  ;;  %v47_v61 = vld [vmem:[%s896_s0 + $0x108] sm:$0xff]  ;;  %v49_v63 = vld [vmem:[%s896_s0 + $0x118] sm:$0xff] }
  0x11   :  { %296 = vst [vmem:[%s899_s3 + $0x60] sm:$0xff] %v232_v7  ;;  %297 = vst [vmem:[%s899_s3 + $0x68] sm:$0xff] %v233_v8  ;;  %v105_v17 = vmul.f32 %v380_v1, %v34_v4  ;;  %v106_v18 = vmul.f32 %v380_v1, %v35_v5  ;;  %v107_v19 = vmul.f32 %v380_v1, %v36_v6  ;;  %v50_v6 = vld [vmem:[%s896_s0 + $0x120] sm:$0xff]  ;;  %v51_v7 = vld [vmem:[%s896_s0 + $0x128] sm:$0xff] }
  0x12   :  { %298 = vst [vmem:[%s899_s3 + $0x70] sm:$0xff] %v234_v9  ;;  %299 = vst [vmem:[%s899_s3 + $0x78] sm:$0xff] %v235_v12  ;;  %v173_v20 = vadd.f32 %v385_v2, %v102_v13  ;;  %v174_v21 = vadd.f32 %v385_v2, %v103_v14  ;;  %v175_v22 = vadd.f32 %v385_v2, %v104_v15  ;;  %v236_v25 = vmax.f32 %v172_v16, 0.0  ;;  %v52_v8 = vld [vmem:[%s896_s0 + $0x130] sm:$0xff]  ;;  %v53_v13 = vld [vmem:[%s896_s0 + $0x138] sm:$0xff] }
  0x13   :  { %v108_v23 = vmul.f32 %v380_v1, %v37_v11  ;;  %v176_v26 = vadd.f32 %v385_v2, %v105_v17  ;;  %v177_v27 = vadd.f32 %v385_v2, %v106_v18  ;;  %v178_v28 = vadd.f32 %v385_v2, %v107_v19 }
  0x14   :  { %v237_v32 = vmax.f32 %v173_v20, 0.0  ;;  %v238_v33 = vmax.f32 %v174_v21, 0.0  ;;  %v239_v34 = vmax.f32 %v175_v22, 0.0  ;;  %300 = vst [vmem:[%s899_s3 + $0x80] sm:$0xff] %v236_v25  ;;  %v109_v42 = vmul.f32 %v380_v1, %v38_v24 }
  0x15   :  { %v179_v35 = vadd.f32 %v385_v2, %v108_v23  ;;  %v240_v39 = vmax.f32 %v176_v26, 0.0  ;;  %v241_v40 = vmax.f32 %v177_v27, 0.0  ;;  %v242_v41 = vmax.f32 %v178_v28, 0.0  ;;  %v54_v26 = vld [vmem:[%s896_s0 + $0x140] sm:$0xff] }
  0x16   :  { %301 = vst [vmem:[%s899_s3 + $0x88] sm:$0xff] %v237_v32  ;;  %302 = vst [vmem:[%s899_s3 + $0x90] sm:$0xff] %v238_v33  ;;  %v110_v45 = vmul.f32 %v380_v1, %v39_v29  ;;  %v111_v46 = vmul.f32 %v380_v1, %v40_v30  ;;  %v112_v47 = vmul.f32 %v380_v1, %v41_v31  ;;  %v55_v31 = vld [vmem:[%s896_s0 + $0x148] sm:$0xff]  ;;  %v56_v32 = vld [vmem:[%s896_s0 + $0x150] sm:$0xff] }
  0x17   :  { %303 = vst [vmem:[%s899_s3 + $0x98] sm:$0xff] %v239_v34  ;;  %v243_v44 = vmax.f32 %v179_v35, 0.0  ;;  %304 = vst [vmem:[%s899_s3 + $0xa0] sm:$0xff] %v240_v39  ;;  %v180_v48 = vadd.f32 %v385_v2, %v109_v42  ;;  %v113_v49 = vmul.f32 %v380_v1, %v42_v36  ;;  %v114_v50 = vmul.f32 %v380_v1, %v43_v37  ;;  %v57_v33 = vld [vmem:[%s896_s0 + $0x158] sm:$0xff]  ;;  %v59_v39 = vld [vmem:[%s896_s0 + $0x168] sm:$0xff] }
  0x18   :  { %305 = vst [vmem:[%s899_s3 + $0xa8] sm:$0xff] %v241_v40  ;;  %306 = vst [vmem:[%s899_s3 + $0xb0] sm:$0xff] %v242_v41  ;;  %v115_v51 = vmul.f32 %v380_v1, %v44_v38  ;;  %v181_v52 = vadd.f32 %v385_v2, %v110_v45  ;;  %v182_v53 = vadd.f32 %v385_v2, %v111_v46  ;;  %v58_v38 = vld [vmem:[%s896_s0 + $0x160] sm:$0xff]  ;;  %v60_v40 = vld [vmem:[%s896_s0 + $0x170] sm:$0xff] }
  0x19   :  { %307 = vst [vmem:[%s899_s3 + $0xb8] sm:$0xff] %v243_v44  ;;  %v183_v54 = vadd.f32 %v385_v2, %v112_v47  ;;  %v116_v55 = vmul.f32 %v380_v1, %v45_v43  ;;  %v244_v57 = vmax.f32 %v180_v48, 0.0  ;;  %v184_v58 = vadd.f32 %v385_v2, %v113_v49  ;;  %v61_v45 = vld [vmem:[%s896_s0 + $0x178] sm:$0xff] }
  0x1a   :  { %v185_v59 = vadd.f32 %v385_v2, %v114_v50  ;;  %v186_v60 = vadd.f32 %v385_v2, %v115_v51  ;;  %v245_v0 = vmax.f32 %v181_v52, 0.0  ;;  %v246_v3 = vmax.f32 %v182_v53, 0.0 }
  0x1b   :  { %v247_v4 = vmax.f32 %v183_v54, 0.0  ;;  %v187_v5 = vadd.f32 %v385_v2, %v116_v55  ;;  %308 = vst [vmem:[%s899_s3 + $0xc0] sm:$0xff] %v244_v57  ;;  %v248_v9 = vmax.f32 %v184_v58, 0.0  ;;  %v117_v12 = vmul.f32 %v380_v1, %v46_v56  ;;  %v62_v58 = vld [vmem:[%s896_s0 + $0x180] sm:$0xff] }
  0x1c   :  { %v249_v10 = vmax.f32 %v185_v59, 0.0  ;;  %v250_v11 = vmax.f32 %v186_v60, 0.0  ;;  %309 = vst [vmem:[%s899_s3 + $0xc8] sm:$0xff] %v245_v0  ;;  %310 = vst [vmem:[%s899_s3 + $0xd0] sm:$0xff] %v246_v3  ;;  %v118_v15 = vmul.f32 %v380_v1, %v47_v61  ;;  %v119_v16 = vmul.f32 %v380_v1, %v48_v62  ;;  %v64_v0 = vld [vmem:[%s896_s0 + $0x190] sm:$0xff]  ;;  %v65_v3 = vld [vmem:[%s896_s0 + $0x198] sm:$0xff] }
  0x1d   :  { %311 = vst [vmem:[%s899_s3 + $0xd8] sm:$0xff] %v247_v4  ;;  %v251_v14 = vmax.f32 %v187_v5, 0.0  ;;  %v120_v17 = vmul.f32 %v380_v1, %v49_v63  ;;  %312 = vst [vmem:[%s899_s3 + $0xe0] sm:$0xff] %v248_v9  ;;  %v188_v18 = vadd.f32 %v385_v2, %v117_v12  ;;  %v121_v19 = vmul.f32 %v380_v1, %v50_v6  ;;  %v63_v63 = vld [vmem:[%s896_s0 + $0x188] sm:$0xff] }
  0x1e   :  { %313 = vst [vmem:[%s899_s3 + $0xe8] sm:$0xff] %v249_v10  ;;  %314 = vst [vmem:[%s899_s3 + $0xf0] sm:$0xff] %v250_v11  ;;  %v122_v20 = vmul.f32 %v380_v1, %v51_v7  ;;  %v123_v21 = vmul.f32 %v380_v1, %v52_v8  ;;  %v189_v22 = vadd.f32 %v385_v2, %v118_v15  ;;  %v66_v8 = vld [vmem:[%s896_s0 + $0x1a0] sm:$0xff]  ;;  %v67_v9 = vld [vmem:[%s896_s0 + $0x1a8] sm:$0xff] }
  0x1f   :  { %315 = vst [vmem:[%s899_s3 + $0xf8] sm:$0xff] %v251_v14  ;;  %v190_v23 = vadd.f32 %v385_v2, %v119_v16  ;;  %v191_v24 = vadd.f32 %v385_v2, %v120_v17  ;;  %v124_v25 = vmul.f32 %v380_v1, %v53_v13  ;;  %v252_v27 = vmax.f32 %v188_v18, 0.0  ;;  %v68_v10 = vld [vmem:[%s896_s0 + $0x1b0] sm:$0xff]  ;;  %v69_v15 = vld [vmem:[%s896_s0 + $0x1b8] sm:$0xff] }
  0x20   :  { %v192_v28 = vadd.f32 %v385_v2, %v121_v19  ;;  %v193_v29 = vadd.f32 %v385_v2, %v122_v20  ;;  %v194_v30 = vadd.f32 %v385_v2, %v123_v21  ;;  %v253_v34 = vmax.f32 %v189_v22, 0.0 }
  0x21   :  { %v254_v35 = vmax.f32 %v190_v23, 0.0  ;;  %v255_v36 = vmax.f32 %v191_v24, 0.0  ;;  %v195_v37 = vadd.f32 %v385_v2, %v124_v25  ;;  %316 = vst [vmem:[%s899_s3 + $0x100] sm:$0xff] %v252_v27  ;;  %v125_v44 = vmul.f32 %v380_v1, %v54_v26 }
  0x22   :  { %v256_v41 = vmax.f32 %v192_v28, 0.0  ;;  %v257_v42 = vmax.f32 %v193_v29, 0.0  ;;  %v258_v43 = vmax.f32 %v194_v30, 0.0  ;;  %317 = vst [vmem:[%s899_s3 + $0x108] sm:$0xff] %v253_v34  ;;  %v126_v47 = vmul.f32 %v380_v1, %v55_v31  ;;  %v70_v28 = vld [vmem:[%s896_s0 + $0x1c0] sm:$0xff]  ;;  %v72_v34 = vld [vmem:[%s896_s0 + $0x1d0] sm:$0xff] }
  0x23   :  { %318 = vst [vmem:[%s899_s3 + $0x110] sm:$0xff] %v254_v35  ;;  %319 = vst [vmem:[%s899_s3 + $0x118] sm:$0xff] %v255_v36  ;;  %v259_v46 = vmax.f32 %v195_v37, 0.0  ;;  %v127_v48 = vmul.f32 %v380_v1, %v56_v32  ;;  %v128_v49 = vmul.f32 %v380_v1, %v57_v33  ;;  %v196_v50 = vadd.f32 %v385_v2, %v125_v44  ;;  %v71_v33 = vld [vmem:[%s896_s0 + $0x1c8] sm:$0xff]  ;;  %v73_v35 = vld [vmem:[%s896_s0 + $0x1d8] sm:$0xff] }
  0x24   :  { %320 = vst [vmem:[%s899_s3 + $0x120] sm:$0xff] %v256_v41  ;;  %321 = vst [vmem:[%s899_s3 + $0x128] sm:$0xff] %v257_v42  ;;  %v129_v51 = vmul.f32 %v380_v1, %v58_v38  ;;  %v130_v52 = vmul.f32 %v380_v1, %v59_v39  ;;  %v131_v53 = vmul.f32 %v380_v1, %v60_v40  ;;  %v74_v40 = vld [vmem:[%s896_s0 + $0x1e0] sm:$0xff]  ;;  %v75_v41 = vld [vmem:[%s896_s0 + $0x1e8] sm:$0xff] }
  0x25   :  { %322 = vst [vmem:[%s899_s3 + $0x130] sm:$0xff] %v258_v43  ;;  %323 = vst [vmem:[%s899_s3 + $0x138] sm:$0xff] %v259_v46  ;;  %v197_v54 = vadd.f32 %v385_v2, %v126_v47  ;;  %v198_v55 = vadd.f32 %v385_v2, %v127_v48  ;;  %v199_v56 = vadd.f32 %v385_v2, %v128_v49  ;;  %v260_v59 = vmax.f32 %v196_v50, 0.0  ;;  %v76_v42 = vld [vmem:[%s896_s0 + $0x1f0] sm:$0xff]  ;;  %v77_v47 = vld [vmem:[%s896_s0 + $0x1f8] sm:$0xff] }
  0x26   :  { %v132_v57 = vmul.f32 %v380_v1, %v61_v45  ;;  %v200_v60 = vadd.f32 %v385_v2, %v129_v51  ;;  %v201_v61 = vadd.f32 %v385_v2, %v130_v52  ;;  %v202_v62 = vadd.f32 %v385_v2, %v131_v53 }
  0x27   :  { %v261_v4 = vmax.f32 %v197_v54, 0.0  ;;  %v262_v5 = vmax.f32 %v198_v55, 0.0  ;;  %v263_v6 = vmax.f32 %v199_v56, 0.0  ;;  %324 = vst [vmem:[%s899_s3 + $0x140] sm:$0xff] %v260_v59  ;;  %v133_v14 = vmul.f32 %v380_v1, %v62_v58 }
  0x28   :  { %v203_v7 = vadd.f32 %v385_v2, %v132_v57  ;;  %v264_v11 = vmax.f32 %v200_v60, 0.0  ;;  %v265_v12 = vmax.f32 %v201_v61, 0.0  ;;  %v266_v13 = vmax.f32 %v202_v62, 0.0 }
  0x29   :  { %325 = vst [vmem:[%s899_s3 + $0x148] sm:$0xff] %v261_v4  ;;  %326 = vst [vmem:[%s899_s3 + $0x150] sm:$0xff] %v262_v5  ;;  %v134_v17 = vmul.f32 %v380_v1, %v63_v63  ;;  %v135_v18 = vmul.f32 %v380_v1, %v64_v0  ;;  %v136_v19 = vmul.f32 %v380_v1, %v65_v3 }
  0x2a   :  { %327 = vst [vmem:[%s899_s3 + $0x158] sm:$0xff] %v263_v6  ;;  %v267_v16 = vmax.f32 %v203_v7, 0.0  ;;  %328 = vst [vmem:[%s899_s3 + $0x160] sm:$0xff] %v264_v11  ;;  %v204_v20 = vadd.f32 %v385_v2, %v133_v14  ;;  %v137_v21 = vmul.f32 %v380_v1, %v66_v8  ;;  %v138_v22 = vmul.f32 %v380_v1, %v67_v9 }
  0x2b   :  { %329 = vst [vmem:[%s899_s3 + $0x168] sm:$0xff] %v265_v12  ;;  %330 = vst [vmem:[%s899_s3 + $0x170] sm:$0xff] %v266_v13  ;;  %v139_v23 = vmul.f32 %v380_v1, %v68_v10  ;;  %v205_v24 = vadd.f32 %v385_v2, %v134_v17  ;;  %v206_v25 = vadd.f32 %v385_v2, %v135_v18 }
  0x2c   :  { %331 = vst [vmem:[%s899_s3 + $0x178] sm:$0xff] %v267_v16  ;;  %v207_v26 = vadd.f32 %v385_v2, %v136_v19  ;;  %v140_v27 = vmul.f32 %v380_v1, %v69_v15  ;;  %v268_v29 = vmax.f32 %v204_v20, 0.0  ;;  %v208_v30 = vadd.f32 %v385_v2, %v137_v21 }
  0x2d   :  { %v209_v31 = vadd.f32 %v385_v2, %v138_v22  ;;  %v210_v32 = vadd.f32 %v385_v2, %v139_v23  ;;  %v269_v36 = vmax.f32 %v205_v24, 0.0  ;;  %v270_v37 = vmax.f32 %v206_v25, 0.0 }
  0x2e   :  { %v271_v38 = vmax.f32 %v207_v26, 0.0  ;;  %v211_v39 = vadd.f32 %v385_v2, %v140_v27  ;;  %332 = vst [vmem:[%s899_s3 + $0x180] sm:$0xff] %v268_v29  ;;  %v272_v43 = vmax.f32 %v208_v30, 0.0  ;;  %v141_v46 = vmul.f32 %v380_v1, %v70_v28 }
  0x2f   :  { %v273_v44 = vmax.f32 %v209_v31, 0.0  ;;  %v274_v45 = vmax.f32 %v210_v32, 0.0  ;;  %333 = vst [vmem:[%s899_s3 + $0x188] sm:$0xff] %v269_v36  ;;  %334 = vst [vmem:[%s899_s3 + $0x190] sm:$0xff] %v270_v37  ;;  %v142_v49 = vmul.f32 %v380_v1, %v71_v33  ;;  %v143_v50 = vmul.f32 %v380_v1, %v72_v34 }
  0x30   :  { %335 = vst [vmem:[%s899_s3 + $0x198] sm:$0xff] %v271_v38  ;;  %v275_v48 = vmax.f32 %v211_v39, 0.0  ;;  %v144_v51 = vmul.f32 %v380_v1, %v73_v35  ;;  %336 = vst [vmem:[%s899_s3 + $0x1a0] sm:$0xff] %v272_v43  ;;  %v212_v52 = vadd.f32 %v385_v2, %v141_v46  ;;  %v145_v53 = vmul.f32 %v380_v1, %v74_v40 }
  0x31   :  { %337 = vst [vmem:[%s899_s3 + $0x1a8] sm:$0xff] %v273_v44  ;;  %338 = vst [vmem:[%s899_s3 + $0x1b0] sm:$0xff] %v274_v45  ;;  %v146_v54 = vmul.f32 %v380_v1, %v75_v41  ;;  %v147_v55 = vmul.f32 %v380_v1, %v76_v42  ;;  %v213_v56 = vadd.f32 %v385_v2, %v142_v49 }
  0x32   :  { %339 = vst [vmem:[%s899_s3 + $0x1b8] sm:$0xff] %v275_v48  ;;  %v214_v57 = vadd.f32 %v385_v2, %v143_v50  ;;  %v215_v58 = vadd.f32 %v385_v2, %v144_v51  ;;  %v148_v59 = vmul.f32 %v380_v1, %v77_v47  ;;  %v276_v60 = vmax.f32 %v212_v52, 0.0 }
  0x33   :  { %v216_v61 = vadd.f32 %v385_v2, %v145_v53  ;;  %v217_v62 = vadd.f32 %v385_v2, %v146_v54  ;;  %v218_v63 = vadd.f32 %v385_v2, %v147_v55  ;;  %v277_v0 = vmax.f32 %v213_v56, 0.0 }
  0x34   :  { %v278_v3 = vmax.f32 %v214_v57, 0.0  ;;  %v279_v4 = vmax.f32 %v215_v58, 0.0  ;;  %v219_v5 = vadd.f32 %v385_v2, %v148_v59  ;;  %340 = vst [vmem:[%s899_s3 + $0x1c0] sm:$0xff] %v276_v60 }
  0x35   :  { %v280_v6 = vmax.f32 %v216_v61, 0.0  ;;  %v281_v7 = vmax.f32 %v217_v62, 0.0  ;;  %v282_v8 = vmax.f32 %v218_v63, 0.0  ;;  %341 = vst [vmem:[%s899_s3 + $0x1c8] sm:$0xff] %v277_v0 }
  0x36   :  { %342 = vst [vmem:[%s899_s3 + $0x1d0] sm:$0xff] %v278_v3  ;;  %343 = vst [vmem:[%s899_s3 + $0x1d8] sm:$0xff] %v279_v4  ;;  %v283_v1 = vmax.f32 %v219_v5, 0.0 }
  0x37   :  { %344 = vst [vmem:[%s899_s3 + $0x1e0] sm:$0xff] %v280_v6  ;;  %345 = vst [vmem:[%s899_s3 + $0x1e8] sm:$0xff] %v281_v7 }
  0x38   :  { %346 = vst [vmem:[%s899_s3 + $0x1f0] sm:$0xff] %v282_v8  ;;  %347 = vst [vmem:[%s899_s3 + $0x1f8] sm:$0xff] %v283_v1 }

// kernel: conv_module_forward.2
= control target key start
LH: loop header
LB: loop body
LE: loop exit
PB: predicated region body
PF: predicated region fallthrough
CT: control target
= control target key end

     0   :  { %s5644_s15 = smov 0   ;;  %s5646_s16 = smov 0   ;;  %s7097_s0 = inlined_call_operand.vmem [shape: f32[2,18,18,4], index: 0, kind: input, shape index: {}]   ;;  %s7098_s1 = inlined_call_operand.vmem [shape: f32[9,4,128], index: 1, kind: input, shape index: {}]   ;;  %s7099_s2 = inlined_call_operand.vmem [shape: f32[2,16,16,128], index: 2, kind: output, shape index: {0}]   ;;  %s7100_s3 = inlined_call_operand.vmem [shape: f32[1,128], index: 3, kind: output, shape index: {1}]   ;;  %s7101_s4 = inlined_call_operand.vmem [shape: f32[1,128], index: 4, kind: output, shape index: {2}]  }
   0x1   :  { %s5648_s17 = smov 0  }
   0x2 LB: > { %s27_s18 = sadd.s32 1, %s5612_s16  ;;  %p4142_p0 = scmp.ge.s32.totalorder %s5616_s17, 1  ;;  %s5616_s17 = sphi %s5648_s17, %s15_s17   ;;  %s5612_s16 = sphi %s5646_s16, %s7356_s16   ;;  %s5608_s15 = sphi %s5644_s15, %s7355_s15  }
   0x3   : > { %p29_p1 = scmp.ge.s32.totalorder %s27_s18, 2  ;;  %p171_p2 = scmp.lt.s32.totalorder %s5616_s17, 3 }
   0x5   : > { %s7358_s18 = smov (%p29_p1, %s27_s18), 0  ;;  %p172_p3 = pnand %p4142_p0, %p171_p2 }
   0x7   : > { %175 = sbr.rel (%p172_p3) target bundleno = 560 (0x230), region = 28 }
   0xe   : > { %p202_p4 = scmp.lt.s32.totalorder %s5608_s15, 1  ;;  %p218_p5 = scmp.eq.s32.totalorder %s5608_s15, 0 }
   0xf   : > { %v5618_v0 = vmov (%p218_p5), 0.0  }
  0x10   : > { %s203_s19 = scalar_select %p202_p4, %s5608_s15, 1 }
  0x11   : > { %223 = sbr.rel (!%p218_p5) target bundleno = 24 (0x18), region = 32  ;;  %224 = vst [vmem:[#allocation2] sm:$0x1] (%p218_p5), %v5618_v0  ;;  %225 = vst [vmem:[#allocation3] sm:$0x1] (%p218_p5), %v5618_v0 }
  0x12   : > { %s5559_s20 = smul.u32 432, %s203_s19  ;;  %s4551_s21 = sshll.u32 %s203_s19, 8 }
  0x13   : > { %s5670_s24 = scalar_lea.vmem %s7099_s2, %s4551_s21 }
  0x14   : > { %s5675_s27 = scalar_lea.vmem %s7097_s0, %s5559_s20 }
  0x18 PF: > { %v4147_v1 = vld [vmem:[%s7098_s1 + $0x4] sm:$0xf]  ;;  %vm474_vm0 = vcmask 1043456   ;;  %v5683_v2 = vld [vmem:[%s7098_s1 + $0x10] sm:$0xf]  ;;  %v5692_v4 = vld [vmem:[%s5675_s27 + $0x8] sm:$0xff] }
  0x19   : > { %v5686_v3 = vld [vmem:[%s5675_s27] sm:$0xff]  ;;  %4851 = vmatprep.subr.msk.mxu1 %vm474_vm0, %v4147_v1  ;;  %5051 = vmatprep.subr.msk.mxu0 %vm474_vm0, %v5683_v2  ;;  %vm326_vm1 = vcmask 1046528   ;;  %v328_v7 = vrot.slane %v5692_v4, 1  ;;  %vm409_vm2 = vcmask 31744   ;;  %v5703_v8 = vld [vmem:[%s5675_s27 + $0x18] sm:$0xff]  ;;  %v5725_v18 = vld [vmem:[%s5675_s27 + $0x30] sm:$0xff] }
  0x1a   : > { %v327_v5 = vrot.slane %v5686_v3, 1  ;;  %v277_v6 = vld [vmem:[%s7098_s1] sm:$0xf]  ;;  %4852 = vmatpush3.msk.msra.mxu1 %vm474_vm0, %v4147_v1  ;;  %5052 = vmatpush3.msk.msra.mxu0 %vm474_vm0, %v5683_v2  ;;  %v4364_v10 = vld [vmem:[%s7098_s1 + $0x14] sm:$0xf]  ;;  %v1827_v11 = vrot.slane %v5703_v8, 1 }
  0x1b   : > { %v5706_v9 = vld [vmem:[%s5675_s27 + $0x20] sm:$0xff]  ;;  %4901 = vmatprep.subr.msk.mxu1 %vm474_vm0, %v277_v6  ;;  %5101 = vmatprep.subr.msk.mxu0 %vm474_vm0, %v4364_v10  ;;  %v5716_v13 = vld [vmem:[%s5675_s27 + $0x10] sm:$0x3]  ;;  %v5719_v14 = vld [vmem:[%s5675_s27 + $0x28] sm:$0x3]  ;;  %v1832_v22 = vrot.slane %v5725_v18, 1 }
  0x1c   : > { %v1828_v12 = vrot.slane %v5706_v9, 1  ;;  %v329_v15 = vsel %vm326_vm1, %v327_v5, %v328_v7  ;;  %v330_v16 = vrot.slane %v5716_v13, 1  ;;  %v1830_v17 = vrot.slane %v5719_v14, 1  ;;  %v5728_v19 = vld [vmem:[%s5675_s27 + $0x38] sm:$0xff]  ;;  %v5731_v20 = vld [vmem:[%s5675_s27 + $0x48] sm:$0xff]  ;;  %v5743_v25 = vld [vmem:[%s5675_s27 + $0x50] sm:$0xff] }
  0x1d   : > { %4853 = vmatprep.mubr.msk.f32.mxu1 %vm409_vm2, %v329_v15  ;;  %v5737_v23 = vrot.slane %v5728_v19, 1  ;;  %v5740_v24 = vld [vmem:[%s5675_s27 + $0x28] sm:$0x3]  ;;  %v5750_v29 = vld [vmem:[%s5675_s27 + $0x40] sm:$0x3]  ;;  %v1837_v30 = vrot.slane %v5731_v20, 1 }
  0x1e   : > { %v1829_v21 = vsel %vm326_vm1, %v1827_v11, %v1828_v12  ;;  %v331_v26 = vsel %vm326_vm1, %v328_v7, %v330_v16  ;;  %v1831_v27 = vsel %vm326_vm1, %v1828_v12, %v1830_v17  ;;  %v335_v28 = vrot.slane %v5740_v24, 1  ;;  %v5754_v31 = vld [vmem:[%s5675_s27 + $0x40] sm:$0x3]  ;;  %v5767_v35 = vld [vmem:[%s5675_s27 + $0x58] sm:$0x3]  ;;  %v5778_v40 = vld [vmem:[%s5675_s27 + $0x68] sm:$0xff] }
  0x1f   : > { %7196 = vst [vmem:[#allocation4_spill] sm:$0xff] %v5737_v23  ;;  %5053 = vmatprep.mubr.msk.f32.mxu0 %vm409_vm2, %v1829_v21  ;;  %4854 = vmatmul.mubr.msk.f32.vlgmr.msra.gmra.mrb[0].mxu1 %vm409_vm2, %v331_v26  ;;  %v5760_v32 = vsel %vm326_vm1, %v1832_v22, %v5737_v23  ;;  %v1835_v33 = vrot.slane %v5750_v29, 1  ;;  %v5764_v34 = vrot.slane %v5743_v25, 1  ;;  %v5770_v36 = vld [vmem:[%s5675_s27 + $0x60] sm:$0xff]  ;;  %v340_v38 = vrot.slane %v5754_v31, 1  ;;  %v5800_v47 = vld [vmem:[%s5675_s27 + $0x78] sm:$0xff] }
  0x20   : > { %5054 = vmatmul.mubr.msk.f32.vlgmr.msra.gmra.mrb[0].mxu0 %vm409_vm2, %v1831_v27  ;;  %7197 = vst [vmem:[#allocation5_spill] sm:$0xff] %v5760_v32  ;;  %4902 = vmatpush3.msk.msra.mxu1 %vm474_vm0, %v277_v6  ;;  %v336_v37 = vsel %vm326_vm1, %v1828_v12, %v335_v28  ;;  %v1840_v39 = vrot.slane %v5767_v35, 1  ;;  %v1842_v43 = vrot.slane %v5770_v36, 1  ;;  %v5791_v44 = vrot.slane %v5778_v40, 1  ;;  %v5794_v45 = vld [vmem:[%s5675_s27 + $0x58] sm:$0x3] }
  0x21   : > { %7198 = vst [vmem:[#allocation6_spill] sm:$0xff] %v5764_v34  ;;  %5102 = vmatpush3.msk.msra.mxu0 %vm474_vm0, %v4364_v10  ;;  %4856 = vmatprep.mubr.msk.f32.mxu1 %vm409_vm2, %v1829_v21  ;;  %v1836_v41 = vsel %vm326_vm1, %v5737_v23, %v1835_v33  ;;  %v5787_v42 = vsel %vm326_vm1, %v1837_v30, %v5764_v34  ;;  %v5797_v46 = vld [vmem:[%s5675_s27 + $0x70] sm:$0x3]  ;;  %v5803_v48 = vld [vmem:[%s5675_s27 + $0x80] sm:$0xff]  ;;  %v345_v51 = vrot.slane %v5794_v45, 1  ;;  %v1847_v54 = vrot.slane %v5800_v47, 1 }
  0x22   : > { %5056 = vmatprep.mubr.msk.f32.mxu0 %vm409_vm2, %v5760_v32  ;;  %7199 = vst [vmem:[#allocation7_spill] sm:$0xff] %v5787_v42  ;;  %7200 = vst [vmem:[#allocation8_spill] sm:$0xff] %v5791_v44  ;;  %v341_v49 = vsel %vm326_vm1, %v5737_v23, %v340_v38  ;;  %v1841_v50 = vsel %vm326_vm1, %v5764_v34, %v1840_v39  ;;  %v1845_v52 = vrot.slane %v5797_v46, 1  ;;  %v5823_v55 = vrot.slane %v5803_v48, 1  ;;  %v5826_v56 = vld [vmem:[%s5675_s27 + $0x70] sm:$0x3] }
  0x23   : > { %4857 = vmatmul.mubr.msk.f32.gmra.mrb[2].mxu1 %vm409_vm2, %v336_v37  ;;  %v5819_v53 = vsel %vm326_vm1, %v1842_v43, %v5791_v44  ;;  %7203 = vst [vmem:[#allocation11_spill] sm:$0xff] %v5826_v56  ;;  %v5829_v57 = vld [vmem:[%s5675_s27 + $0x88] sm:$0x3]  ;;  %v5832_v58 = vld [vmem:[%s5675_s27 + $0x90] sm:$0xff]  ;;  %v5835_v59 = vld [vmem:[%s5675_s27 + $0x98] sm:$0xff]  ;;  %v346_v60 = vsel %vm326_vm1, %v5764_v34, %v345_v51  ;;  %v350_v62 = vrot.slane %v5826_v56, 1 }
  0x24   : > { %5057 = vmatmul.mubr.msk.f32.gmra.mrb[2].mxu0 %vm409_vm2, %v1836_v41  ;;  %4859 = vmatprep.mubr.msk.f32.mxu1 %vm409_vm2, %v5760_v32  ;;  %7201 = vst [vmem:[#allocation9_spill] sm:$0xff] %v5819_v53  ;;  %7202 = vst [vmem:[#allocation10_spill] sm:$0xff] %v5823_v55  ;;  %v1846_v61 = vsel %vm326_vm1, %v5791_v44, %v1845_v52  ;;  %v1850_v63 = vrot.slane %v5829_v57, 1  ;;  %v5852_v0 = vld [vmem:[%s7098_s1 + $0x18] sm:$0xf]  ;;  %v5856_v1 = vsel %vm326_vm1, %v1847_v54, %v5823_v55  ;;  %v5871_v11 = vld [vmem:[%s5675_s27 + $0xa8] sm:$0xff] }
  0x25   : > { %5059 = vmatprep.mubr.msk.f32.mxu0 %vm409_vm2, %v5787_v42  ;;  %7204 = vst [vmem:[#allocation12_spill] sm:$0xff] %v5856_v1  ;;  %v1852_v5 = vrot.slane %v5832_v58, 1  ;;  %v5860_v6 = vrot.slane %v5835_v59, 1  ;;  %v5863_v7 = vld [vmem:[%s5675_s27 + $0x88] sm:$0x3]  ;;  %5151 = vmatprep.subr.msk.mxu0 %vm474_vm0, %v5852_v0  ;;  %v5874_v12 = vld [vmem:[%s5675_s27 + $0xb0] sm:$0xff]  ;;  %v351_v15 = vsel %vm326_vm1, %v5791_v44, %v350_v62 }
  0x26   : > { %7206 = vst [vmem:[#allocation14_spill] sm:$0xff] %v5863_v7  ;;  %v5866_v10 = vld [vmem:[%s5675_s27 + $0xa0] sm:$0x3]  ;;  %v1851_v16 = vsel %vm326_vm1, %v5823_v55, %v1850_v63  ;;  %v355_v17 = vrot.slane %v5863_v7, 1  ;;  %v1857_v26 = vrot.slane %v5871_v11, 1  ;;  %v5894_v27 = vrot.slane %v5874_v12, 1 }
  0x27   : > { %4860 = vmatmul.mubr.msk.f32.gmra.mrb[4].mxu1 %vm409_vm2, %v341_v49  ;;  %7205 = vst [vmem:[#allocation13_spill] sm:$0xff] %v5860_v6  ;;  %v1855_v21 = vrot.slane %v5866_v10, 1  ;;  %v5890_v22 = vsel %vm326_vm1, %v1852_v5, %v5860_v6  ;;  %v5897_v28 = vld [vmem:[%s5675_s27 + $0xa0] sm:$0x3]  ;;  %v5900_v30 = vld [vmem:[%s5675_s27 + $0xb8] sm:$0x3] }
  0x28   : > { %5060 = vmatmul.mubr.msk.f32.gmra.mrb[4].mxu0 %vm409_vm2, %v1841_v50  ;;  %4862 = vmatprep.mubr.msk.f32.mxu1 %vm409_vm2, %v5787_v42  ;;  %7207 = vst [vmem:[#allocation15_spill] sm:$0xff] %v5890_v22  ;;  %7208 = vst [vmem:[#allocation16_spill] sm:$0xff] %v5894_v27  ;;  %v5903_v33 = vld [vmem:[%s5675_s27 + $0xc0] sm:$0xff]  ;;  %v5906_v37 = vld [vmem:[%s5675_s27 + $0xc8] sm:$0xff]  ;;  %v356_v38 = vsel %vm326_vm1, %v5823_v55, %v355_v17  ;;  %v360_v41 = vrot.slane %v5897_v28, 1  ;;  %v1860_v43 = vrot.slane %v5900_v30, 1 }
  0x29   : > { %5062 = vmatprep.mubr.msk.f32.mxu0 %vm409_vm2, %v5819_v53  ;;  %7209 = vst [vmem:[#allocation17_spill] sm:$0xff] %v5897_v28  ;;  %v1856_v39 = vsel %vm326_vm1, %v5860_v6, %v1855_v21  ;;  %v5923_v49 = vld [vmem:[%s7098_s1 + $0x8] sm:$0xf]  ;;  %v5927_v50 = vsel %vm326_vm1, %v1857_v26, %v5894_v27  ;;  %v1862_v51 = vrot.slane %v5903_v33, 1  ;;  %v5931_v52 = vrot.slane %v5906_v37, 1  ;;  %v5965_v26 = vld [vmem:[%s5675_s27 + $0xd8] sm:$0xff] }
  0x2a   : > { %7210 = vst [vmem:[#allocation18_spill] sm:$0xff] %v5927_v50  ;;  %v5934_v54 = vld [vmem:[%s5675_s27 + $0xb8] sm:$0x3]  ;;  %4951 = vmatprep.subr.msk.mxu1 %vm474_vm0, %v5923_v49  ;;  %v1861_v62 = vsel %vm326_vm1, %v5894_v27, %v1860_v43  ;;  %v2233_v17 = vrot.slane %v5703_v8, 2  ;;  %v5962_v21 = vrot.slane %v5706_v9, 2  ;;  %vm995_vm3 = vcmask 1045504  }
  0x2b   : > { %4863 = vmatmul.mubr.msk.f32.gmra.mrb[6].mxu1 %vm409_vm2, %v346_v60  ;;  %7211 = vst [vmem:[#allocation19_spill] sm:$0xff] %v5931_v52  ;;  %7212 = vst [vmem:[#allocation20_spill] sm:$0xff] %v5934_v54  ;;  %v5937_v60 = vld [vmem:[%s5675_s27 + $0xd0] sm:$0x3]  ;;  %v365_v63 = vrot.slane %v5934_v54, 1  ;;  %v6037_v44 = vld [vmem:[%s5675_s27 + $0x108] sm:$0xff] }
  0x2c   : > { %5063 = vmatmul.mubr.msk.f32.gmra.mrb[6].mxu0 %vm409_vm2, %v1846_v61  ;;  %4865 = vmatprep.mubr.msk.f32.mxu1 %vm409_vm2, %v5819_v53  ;;  %v361_v61 = vsel %vm326_vm1, %v5860_v6, %v360_v41  ;;  %v1865_v5 = vrot.slane %v5937_v60, 1  ;;  %v5983_v6 = vld [vmem:[%s5675_s27 + $0xe8] sm:$0x3]  ;;  %v6040_v53 = vld [vmem:[%s5675_s27 + $0x110] sm:$0xff]  ;;  %v6045_v42 = vld [vmem:[%s7098_s1 + $0x1c] sm:$0xf] }
  0x2d   : > { %5065 = vmatprep.mubr.msk.f32.mxu0 %vm409_vm2, %v5856_v1  ;;  %v366_v43 = vsel %vm326_vm1, %v5894_v27, %v365_v63  ;;  %7215 = vst [vmem:[#allocation23_spill] sm:$0xff] %v5983_v6  ;;  %v375_v55 = vrot.slane %v5983_v6, 1  ;;  %v6024_v63 = vld [vmem:[%s5675_s27 + $0x100] sm:$0x3]  ;;  %v2246_v34 = vrot.slane %v5767_v35, 2  ;;  %v382_v35 = vrot.slane %v6037_v44, 1 }
  0x2e   : > { %7218 = vst [vmem:[#allocation26_spill] sm:$0xff] %v6024_v63  ;;  %v6054_v6 = vld [vmem:[%s5675_s27 + $0x118] sm:$0x3]  ;;  %v2251_v32 = vrot.slane %v5797_v46, 2  ;;  %v6125_v54 = vld [vmem:[%s5675_s27 + $0x140] sm:$0xff]  ;;  %v1004_v7 = vrot.slane %v5740_v24, 2 }
  0x2f   : > { %4866 = vmatmul.mubr.msk.f32.gmra.mrb[8].mxu1 %vm409_vm2, %v351_v15  ;;  %v5954_v15 = vld [vmem:[%s5675_s27 + $0xd0] sm:$0x3]  ;;  %7221 = vst [vmem:[#allocation28_spill] sm:$0xff] %v6054_v6  ;;  %v1009_v24 = vrot.slane %v5754_v31, 2  ;;  %p4020_p6 = scmp.eq.s32.totalorder %s5608_s15, 1 }
  0x30   : > { %5066 = vmatmul.mubr.msk.f32.gmra.mrb[8].mxu0 %vm409_vm2, %v1851_v16  ;;  %4868 = vmatprep.mubr.msk.f32.mxu1 %vm409_vm2, %v5856_v1  ;;  %7213 = vst [vmem:[#allocation21_spill] sm:$0xff] %v5954_v15  ;;  %v5958_v16 = vsel %vm326_vm1, %v1862_v51, %v5931_v52  ;;  %v370_v41 = vrot.slane %v5954_v15, 1  ;;  %v1866_v51 = vsel %vm326_vm1, %v5931_v52, %v1865_v5  ;;  %v6001_v5 = vrot.slane %v5728_v19, 2 }
  0x31   : > { %5068 = vmatprep.mubr.msk.f32.mxu0 %vm409_vm2, %v5890_v22  ;;  %7214 = vst [vmem:[#allocation22_spill] sm:$0xff] %v5958_v16  ;;  %v2241_v1 = vrot.slane %v5750_v29, 2 }
  0x32   : > { %v6170_v31 = vsel %vm995_vm3, %v6001_v5, %v1009_v24  ;;  %v6204_v24 = vld [vmem:[%s5675_s27 + $0x168] sm:$0xff] }
  0x33   : > { %4869 = vmatmul.mubr.msk.f32.gmra.mrb[10].mxu1 %vm409_vm2, %v356_v38  ;;  %v5968_v38 = vld [vmem:[%s5675_s27 + $0xe0] sm:$0xff] }
  0x34   : > { %5069 = vmatmul.mubr.msk.f32.gmra.mrb[10].mxu0 %vm409_vm2, %v1856_v39  ;;  %4871 = vmatprep.mubr.msk.f32.mxu1 %vm409_vm2, %v5890_v22  ;;  %v2236_v39 = vrot.slane %v5719_v14, 2  ;;  %v5987_v14 = vsel %vm995_vm3, %v2233_v17, %v5962_v21  ;;  %v5997_v22 = vld [vmem:[%s5675_s27 + $0xf8] sm:$0xff]  ;;  %v371_v17 = vsel %vm326_vm1, %v5931_v52, %v370_v41  ;;  %v2243_v41 = vrot.slane %v5731_v20, 2 }
  0x35   : > { %5071 = vmatprep.mubr.msk.f32.mxu0 %vm409_vm2, %v5927_v50  ;;  %v7220_v52 = vrot.slane %v5725_v18, 2 }
  0x36   : > { %v2237_v27 = vsel %vm995_vm3, %v5962_v21, %v2236_v39  ;;  %v6021_v39 = vrot.slane %v5743_v25, 2 }
  0x37   : > { %4872 = vmatmul.mubr.msk.f32.gmra.mrb[12].mxu1 %vm409_vm2, %v361_v61  ;;  %v372_v61 = vrot.slane %v5965_v26, 1 }
  0x38   : > { %5072 = vmatmul.mubr.msk.f32.gmra.mrb[12].mxu0 %vm409_vm2, %v1861_v62  ;;  %4874 = vmatprep.mubr.msk.f32.mxu1 %vm409_vm2, %v5927_v50  ;;  %v5991_v62 = vrot.slane %v5968_v38, 1  ;;  %v5994_v50 = vld [vmem:[%s5675_s27 + $0xf0] sm:$0xff]  ;;  %v2247_v23 = vsel %vm995_vm3, %v6021_v39, %v2246_v34 }
  0x39   : > { %5074 = vmatprep.mubr.msk.f32.mxu0 %vm409_vm2, %v5958_v16 }
  0x3a   : > { %7216 = vst [vmem:[#allocation24_spill] sm:$0xff] %v5991_v62  ;;  %v6028_v29 = vsel %vm326_vm1, %v372_v61, %v5991_v62  ;;  %v376_v61 = vsel %vm326_vm1, %v5991_v62, %v375_v55  ;;  %v6068_v55 = vsel %vm995_vm3, %v2243_v41, %v6021_v39  ;;  %v2248_v62 = vrot.slane %v5770_v36, 2 }
  0x3b   : > { %4875 = vmatmul.mubr.msk.f32.gmra.mrb[14].mxu1 %vm409_vm2, %v366_v43  ;;  %v377_v43 = vrot.slane %v5994_v50, 1  ;;  %7219 = vst [vmem:[#allocation27_spill] sm:$0xff] %v6028_v29  ;;  %v385_v41 = vrot.slane %v6054_v6, 1 }
  0x3c   : > { %5075 = vmatmul.mubr.msk.f32.gmra.mrb[14].mxu0 %vm409_vm2, %v1866_v51  ;;  %4877 = vmatprep.mubr.msk.f32.mxu1 %vm409_vm2, %v5958_v16  ;;  %v6017_v51 = vrot.slane %v5997_v22, 1  ;;  %v6034_v16 = vsel %vm995_vm3, %v7220_v52, %v6001_v5  ;;  %v380_v52 = vrot.slane %v6024_v63, 1 }
  0x3d   : > { %5103 = vmatprep.mubr.msk.f32.mxu0 %vm409_vm2, %v5987_v14 }
  0x3e   : > { %7217 = vst [vmem:[#allocation25_spill] sm:$0xff] %v6017_v51  ;;  %v381_v63 = vsel %vm326_vm1, %v6017_v51, %v380_v52  ;;  %v6106_v52 = vrot.slane %v5803_v48, 2 }
  0x3f   : > { %4878 = vmatmul.mubr.msk.f32.gmra.mrb[16].mxu1 %vm409_vm2, %v371_v17  ;;  %v2242_v17 = vsel %vm995_vm3, %v6001_v5, %v2241_v1  ;;  %v6078_v1 = vrot.slane %v5778_v40, 2  ;;  %v6190_v5 = vrot.slane %v5874_v12, 2 }
  0x40   : > { %5104 = vmatmul.mubr.msk.f32.vlgmr.msra.gmra.mrb[0].mxu0 %vm409_vm2, %v2237_v27  ;;  %4880 = vmatprep.mubr.msk.f32.mxu1 %vm409_vm2, %v6028_v29  ;;  %v6064_v27 = vsel %vm326_vm1, %v377_v43, %v6017_v51  ;;  %v6081_v43 = vld [vmem:[%s5675_s27 + $0x120] sm:$0xff]  ;;  %v6084_v29 = vld [vmem:[%s5675_s27 + $0x128] sm:$0xff]  ;;  %v6109_v51 = vld [vmem:[%s5675_s27 + $0x130] sm:$0x3] }
  0x41   : > { %5152 = vmatpush3.msk.msra.mxu0 %vm474_vm0, %v5852_v0  ;;  %7222 = vst [vmem:[#allocation29_spill] sm:$0xff] %v6064_v27  ;;  %5106 = vmatprep.mubr.msk.f32.mxu0 %vm409_vm2, %v6034_v16  ;;  %v6074_v0 = vrot.slane %v6040_v53, 1  ;;  %7224 = vst [vmem:[#allocation31_spill] sm:$0xff] %v6078_v1  ;;  %v387_v6 = vrot.slane %v6081_v43, 1  ;;  %v6117_v46 = vsel %vm995_vm3, %v2248_v62, %v6078_v1  ;;  %v390_v28 = vrot.slane %v6109_v51, 1 }
  0x42   : > { %5201 = vmatprep.subr.msk.mxu0 %vm474_vm0, %v6045_v42  ;;  %7226 = vst [vmem:[#allocation33_spill] sm:$0xff] %v6109_v51  ;;  %7228 = vst [vmem:[#allocation35_spill] sm:$0xff] %v6117_v46  ;;  %v2256_v62 = vrot.slane %v5829_v57, 2  ;;  %v6152_v57 = vrot.slane %v6125_v54, 1  ;;  %v6162_v51 = vld [vmem:[%s5675_s27 + $0x158] sm:$0xff] }
  0x43   : > { %7223 = vst [vmem:[#allocation30_spill] sm:$0xff] %v6074_v0  ;;  %4881 = vmatmul.mubr.msk.f32.gmra.mrb[18].mxu1 %vm409_vm2, %v376_v61  ;;  %v6102_v61 = vrot.slane %v6084_v29, 1  ;;  %v6113_v34 = vsel %vm326_vm1, %v382_v35, %v6074_v0  ;;  %v386_v15 = vsel %vm326_vm1, %v6074_v0, %v385_v41  ;;  %v2252_v35 = vsel %vm995_vm3, %v6078_v1, %v2251_v32  ;;  %v6148_v41 = vld [vmem:[%s5675_s27 + $0x148] sm:$0x3] }
  0x44   : > { %5107 = vmatmul.mubr.msk.f32.gmra.mrb[2].mxu0 %vm409_vm2, %v2242_v17  ;;  %4883 = vmatprep.mubr.msk.f32.mxu1 %vm409_vm2, %v6064_v27  ;;  %v2253_v17 = vrot.slane %v5800_v47, 2  ;;  %7227 = vst [vmem:[#allocation34_spill] sm:$0xff] %v6113_v34  ;;  %v6120_v27 = vld [vmem:[%s5675_s27 + $0x138] sm:$0xff]  ;;  %7230 = vst [vmem:[#allocation37_spill] sm:$0xff] %v6148_v41  ;;  %v6156_v0 = vrot.slane %v5835_v59, 2  ;;  %v395_v56 = vrot.slane %v6148_v41, 1 }
  0x45   : > { %5109 = vmatprep.mubr.msk.f32.mxu0 %vm409_vm2, %v6068_v55  ;;  %7225 = vst [vmem:[#allocation32_spill] sm:$0xff] %v6102_v61  ;;  %v392_v32 = vrot.slane %v6120_v27, 1  ;;  %7231 = vst [vmem:[#allocation38_spill] sm:$0xff] %v6152_v57  ;;  %v391_v1 = vsel %vm326_vm1, %v6102_v61, %v390_v28  ;;  %v2263_v28 = vrot.slane %v5871_v11, 2 }
  0x46   : > { %7232 = vst [vmem:[#allocation39_spill] sm:$0xff] %v6156_v0 }
  0x47   : > { %4884 = vmatmul.mubr.msk.f32.gmra.mrb[20].mxu1 %vm409_vm2, %v381_v63  ;;  %v6140_v63 = vsel %vm326_vm1, %v387_v6, %v6102_v61  ;;  %v6159_v6 = vld [vmem:[%s5675_s27 + $0x150] sm:$0xff] }
  0x48   : > { %5110 = vmatmul.mubr.msk.f32.gmra.mrb[4].mxu0 %vm409_vm2, %v2247_v23  ;;  %4886 = vmatprep.mubr.msk.f32.mxu1 %vm409_vm2, %v6113_v34  ;;  %7229 = vst [vmem:[#allocation36_spill] sm:$0xff] %v6140_v63  ;;  %v6144_v23 = vsel %vm995_vm3, %v2253_v17, %v6106_v52  ;;  %v2258_v34 = vrot.slane %v5832_v58, 2  ;;  %v6166_v17 = vsel %vm995_vm3, %v5962_v21, %v1004_v7  ;;  %v2261_v7 = vrot.slane %v5866_v10, 2  ;;  %v6207_v61 = vld [vmem:[%s5675_s27 + $0x170] sm:$0xff] }
  0x49   : > { %5112 = vmatprep.mubr.msk.f32.mxu0 %vm409_vm2, %v6117_v46  ;;  %v2257_v46 = vsel %vm995_vm3, %v6106_v52, %v2256_v62  ;;  %v6186_v21 = vrot.slane %v6162_v51, 1  ;;  %v6197_v10 = vsel %vm326_vm1, %v392_v32, %v6152_v57 }
  0x4a   : > { %7235 = vst [vmem:[#allocation42_spill] sm:$0xff] %v6197_v10  ;;  %v6201_v62 = vsel %vm995_vm3, %v2258_v34, %v6156_v0  ;;  %v2262_v32 = vsel %vm995_vm3, %v6156_v0, %v2261_v7  ;;  %v6231_v7 = vrot.slane %v6207_v61, 1  ;;  %v2271_v0 = vrot.slane %v5937_v60, 2 }
  0x4b   : > { %4887 = vmatmul.mubr.msk.f32.gmra.mrb[22].mxu1 %vm409_vm2, %v386_v15  ;;  %v397_v15 = vrot.slane %v6159_v6, 1  ;;  %7233 = vst [vmem:[#allocation40_spill] sm:$0xff] %v6186_v21 }
  0x4c   : > { %5113 = vmatmul.mubr.msk.f32.gmra.mrb[6].mxu0 %vm409_vm2, %v2252_v35  ;;  %4889 = vmatprep.mubr.msk.f32.mxu1 %vm409_vm2, %v6140_v63  ;;  %v6193_v35 = vld [vmem:[%s5675_s27 + $0x160] sm:$0x3]  ;;  %v396_v63 = vsel %vm326_vm1, %v6152_v57, %v395_v56  ;;  %v2266_v56 = vrot.slane %v5900_v30, 2  ;;  %7237 = vst [vmem:[#allocation44_spill] sm:$0xff] %v6231_v7  ;;  %v2268_v57 = vrot.slane %v5903_v33, 2 }
  0x4d   : > { %5115 = vmatprep.mubr.msk.f32.mxu0 %vm409_vm2, %v6144_v23  ;;  %7234 = vst [vmem:[#allocation41_spill] sm:$0xff] %v6193_v35  ;;  %v400_v41 = vrot.slane %v6193_v35, 1  ;;  %v6222_v34 = vsel %vm326_vm1, %v397_v15, %v6186_v21  ;;  %v6238_v35 = vld [vmem:[%s5675_s27 + $0x178] sm:$0x3] }
  0x4e   : > { %7236 = vst [vmem:[#allocation43_spill] sm:$0xff] %v6222_v34  ;;  %7238 = vst [vmem:[#allocation45_spill] sm:$0xff] %v6238_v35  ;;  %v2267_v15 = vsel %vm995_vm3, %v6190_v5, %v2266_v56 }
  0x4f   : > { %4890 = vmatmul.mubr.msk.f32.gmra.mrb[24].mxu1 %vm409_vm2, %v391_v1  ;;  %v6226_v1 = vsel %vm995_vm3, %v2263_v28, %v6190_v5  ;;  %v401_v30 = vsel %vm326_vm1, %v6186_v21, %v400_v41  ;;  %v405_v28 = vrot.slane %v6238_v35, 1  ;;  %v6262_v21 = vrot.slane %v5968_v38, 2  ;;  %v6335_v35 = vld [vmem:[%s5675_s27 + $0x130] sm:$0x3] }
  0x50   : > { %5116 = vmatmul.mubr.msk.f32.gmra.mrb[8].mxu0 %vm409_vm2, %v2257_v46  ;;  %4892 = vmatprep.mubr.msk.f32.mxu1 %vm409_vm2, %v6197_v10  ;;  %v402_v46 = vrot.slane %v6204_v24, 1  ;;  %v6235_v10 = vrot.slane %v5906_v37, 2  ;;  %7249 = vst [vmem:[#allocation56_spill] sm:$0xff] %v6335_v35 }
  0x51   : > { %5118 = vmatprep.mubr.msk.f32.mxu0 %vm409_vm2, %v6201_v62  ;;  %7240 = vst [vmem:[#allocation47_spill] sm:$0xff] %v6262_v21  ;;  %v406_v60 = vsel %vm326_vm1, %v6231_v7, %v405_v28 }
  0x52   : > { %v6258_v41 = vsel %vm995_vm3, %v2268_v57, %v6235_v10  ;;  %v2272_v57 = vsel %vm995_vm3, %v6235_v10, %v2271_v0 }
  0x53   : > { %4893 = vmatmul.mubr.msk.f32.gmra.mrb[26].mxu1 %vm409_vm2, %v396_v63  ;;  %v6254_v63 = vsel %vm326_vm1, %v402_v46, %v6231_v7  ;;  %v6312_v7 = vld [vmem:[%s7098_s1 + $0xc] sm:$0xf] }
  0x54   : > { %5119 = vmatmul.mubr.msk.f32.gmra.mrb[10].mxu0 %vm409_vm2, %v2262_v32  ;;  %4895 = vmatprep.mubr.msk.f32.mxu1 %vm409_vm2, %v6222_v34  ;;  %7239 = vst [vmem:[#allocation46_spill] sm:$0xff] %v6254_v63  ;;  %v2273_v32 = vrot.slane %v5965_v26, 2  ;;  %v6265_v34 = vld [vmem:[%s5675_s27 + $0xe8] sm:$0x3] }
  0x55   : > { %5121 = vmatprep.mubr.msk.f32.mxu0 %vm409_vm2, %v6226_v1  ;;  %7241 = vst [vmem:[#allocation48_spill] sm:$0xff] %v6265_v34  ;;  %v2276_v56 = vrot.slane %v6265_v34, 2  ;;  %v6300_v34 = vrot.slane %v6040_v53, 2 }
  0x56   : > { %v6280_v46 = vsel %vm995_vm3, %v2273_v32, %v6262_v21  ;;  %v2283_v32 = vrot.slane %v6037_v44, 2 }
  0x57   : > { %4896 = vmatmul.mubr.msk.f32.gmra.mrb[28].mxu1 %vm409_vm2, %v401_v30  ;;  %v6283_v30 = vld [vmem:[%s5675_s27 + $0x100] sm:$0x3]  ;;  %v2277_v0 = vsel %vm995_vm3, %v6262_v21, %v2276_v56  ;;  %7244 = vst [vmem:[#allocation51_spill] sm:$0xff] %v6300_v34 }
  0x58   : > { %5122 = vmatmul.mubr.msk.f32.gmra.mrb[12].mxu0 %vm409_vm2, %v2267_v15  ;;  %4898 = vmatprep.mubr.msk.f32.mxu1 %vm409_vm2, %v6254_v63  ;;  %7242 = vst [vmem:[#allocation49_spill] sm:$0xff] %v6283_v30  ;;  %v2278_v15 = vrot.slane %v5994_v50, 2  ;;  %v6287_v63 = vrot.slane %v5997_v22, 2  ;;  %v2281_v28 = vrot.slane %v6283_v30, 2  ;;  %v6328_v30 = vsel %vm995_vm3, %v2283_v32, %v6300_v34 }
  0x59   : > { %5124 = vmatprep.mubr.msk.f32.mxu0 %vm409_vm2, %v6258_v41  ;;  %7247 = vst [vmem:[#allocation54_spill] sm:$0xff] %v6328_v30 }
  0x5a   : > { %7243 = vst [vmem:[#allocation50_spill] sm:$0xff] %v6287_v63  ;;  %v2282_v56 = vsel %vm995_vm3, %v6287_v63, %v2281_v28  ;;  %v2291_v28 = vrot.slane %v6335_v35, 2 }
  0x5b   : > { %4899 = vmatmul.mubr.msk.f32.gmra.mrb[30].mxu1 %vm409_vm2, %v406_v60  ;;  %v6303_v60 = vld [vmem:[%s5675_s27 + $0x118] sm:$0x3] }
  0x5c   : > { %5125 = vmatmul.mubr.msk.f32.gmra.mrb[14].mxu0 %vm409_vm2, %v2272_v57  ;;  %4903 = vmatprep.mubr.msk.f32.mxu1 %vm409_vm2, %v5686_v3  ;;  %7245 = vst [vmem:[#allocation52_spill] sm:$0xff] %v6303_v60  ;;  %v6307_v57 = vsel %vm995_vm3, %v2278_v15, %v6287_v63  ;;  %v2286_v15 = vrot.slane %v6303_v60, 2  ;;  %v6358_v60 = vld [vmem:[%s5675_s27 + $0x148] sm:$0x3]  ;;  %v6403_v63 = vld [vmem:[%s5675_s27 + $0x180] sm:$0xff] }
  0x5d   : > { %5127 = vmatprep.mubr.msk.f32.mxu0 %vm409_vm2, %v6280_v46  ;;  %7246 = vst [vmem:[#allocation53_spill] sm:$0xff] %v6307_v57  ;;  %7252 = vst [vmem:[#allocation59_spill] sm:$0xff] %v6358_v60 }
  0x5f   : > { %4904 = vmatmul.mubr.msk.f32.vlgmr.msra.gmra.mrb[0].mxu1 %vm409_vm2, %v5692_v4 }
  0x60   : > { %5128 = vmatmul.mubr.msk.f32.gmra.mrb[16].mxu0 %vm409_vm2, %v2277_v0  ;;  %4952 = vmatpush3.msk.msra.mxu1 %vm474_vm0, %v5923_v49  ;;  %v2288_v0 = vrot.slane %v6081_v43, 2  ;;  %v6332_v49 = vrot.slane %v6084_v29, 2 }
  0x61   : > { %4906 = vmatprep.mubr.msk.f32.mxu1 %vm409_vm2, %v5703_v8  ;;  %5130 = vmatprep.mubr.msk.f32.mxu0 %vm409_vm2, %v6307_v57  ;;  %v2287_v8 = vsel %vm995_vm3, %v6300_v34, %v2286_v15  ;;  %v6376_v34 = vrot.slane %v6162_v51, 2 }
  0x62   : > { %7248 = vst [vmem:[#allocation55_spill] sm:$0xff] %v6332_v49  ;;  %5001 = vmatprep.subr.msk.mxu1 %vm474_vm0, %v6312_v7  ;;  %v6351_v32 = vsel %vm995_vm3, %v2288_v0, %v6332_v49  ;;  %v2292_v15 = vsel %vm995_vm3, %v6332_v49, %v2291_v28  ;;  %v2296_v0 = vrot.slane %v6358_v60, 2  ;;  %v2303_v49 = vrot.slane %v6204_v24, 2 }
  0x63   : > { %4907 = vmatmul.mubr.msk.f32.gmra.mrb[2].mxu1 %vm409_vm2, %v5706_v9  ;;  %7250 = vst [vmem:[#allocation57_spill] sm:$0xff] %v6351_v32  ;;  %v2293_v9 = vrot.slane %v6120_v27, 2  ;;  %7254 = vst [vmem:[#allocation61_spill] sm:$0xff] %v6376_v34 }
  0x64   : > { %5131 = vmatmul.mubr.msk.f32.gmra.mrb[18].mxu0 %vm409_vm2, %v2282_v56  ;;  %4909 = vmatprep.mubr.msk.f32.mxu1 %vm409_vm2, %v5725_v18  ;;  %v6355_v56 = vrot.slane %v6125_v54, 2 }
  0x65   : > { %5133 = vmatprep.mubr.msk.f32.mxu0 %vm409_vm2, %v6328_v30  ;;  %v6379_v30 = vld [vmem:[%s5675_s27 + $0x160] sm:$0x3] }
  0x66   : > { %7251 = vst [vmem:[#allocation58_spill] sm:$0xff] %v6355_v56  ;;  %v6372_v35 = vsel %vm995_vm3, %v2293_v9, %v6355_v56  ;;  %7255 = vst [vmem:[#allocation62_spill] sm:$0xff] %v6379_v30  ;;  %v2297_v28 = vsel %vm995_vm3, %v6355_v56, %v2296_v0  ;;  %v2301_v9 = vrot.slane %v6379_v30, 2  ;;  %v2308_v56 = vrot.slane %v6403_v63, 2 }
  0x67   : > { %4910 = vmatmul.mubr.msk.f32.gmra.mrb[4].mxu1 %vm409_vm2, %v5728_v19  ;;  %7253 = vst [vmem:[#allocation60_spill] sm:$0xff] %v6372_v35 }
  0x68   : > { %5134 = vmatmul.mubr.msk.f32.gmra.mrb[20].mxu0 %vm409_vm2, %v2287_v8  ;;  %4912 = vmatprep.mubr.msk.f32.mxu1 %vm409_vm2, %v5731_v20  ;;  %v2298_v8 = vrot.slane %v6159_v6, 2  ;;  %v2302_v0 = vsel %vm995_vm3, %v6376_v34, %v2301_v9 }
  0x69   : > { %5136 = vmatprep.mubr.msk.f32.mxu0 %vm409_vm2, %v6351_v32  ;;  %v6400_v32 = vld [vmem:[%s5675_s27 + $0x178] sm:$0x3] }
  0x6a   : > { %v6393_v60 = vsel %vm995_vm3, %v2298_v8, %v6376_v34  ;;  %7258 = vst [vmem:[#allocation65_spill] sm:$0xff] %v6400_v32  ;;  %v2306_v8 = vrot.slane %v6400_v32, 2 }
  0x6b   : > { %4913 = vmatmul.mubr.msk.f32.gmra.mrb[6].mxu1 %vm409_vm2, %v5743_v25  ;;  %7256 = vst [vmem:[#allocation63_spill] sm:$0xff] %v6393_v60 }
  0x6c   : > { %5137 = vmatmul.mubr.msk.f32.gmra.mrb[22].mxu0 %vm409_vm2, %v2292_v15  ;;  %4915 = vmatprep.mubr.msk.f32.mxu1 %vm409_vm2, %v5770_v36  ;;  %v6397_v15 = vrot.slane %v6207_v61, 2 }
  0x6d   : > { %5139 = vmatprep.mubr.msk.f32.mxu0 %vm409_vm2, %v6372_v35  ;;  %v6406_v35 = vld [vmem:[%s5675_s27 + $0x188] sm:$0xff] }
  0x6e   : > { %7257 = vst [vmem:[#allocation64_spill] sm:$0xff] %v6397_v15  ;;  %v6420_v30 = vsel %vm995_vm3, %v2303_v49, %v6397_v15  ;;  %v6424_v57 = vrot.slane %v6406_v35, 2  ;;  %v2307_v49 = vsel %vm995_vm3, %v6397_v15, %v2306_v8 }
  0x6f   : > { %4916 = vmatmul.mubr.msk.f32.gmra.mrb[8].mxu1 %vm409_vm2, %v5778_v40  ;;  %7259 = vst [vmem:[#allocation66_spill] sm:$0xff] %v6420_v30 }
  0x70   : > { %5140 = vmatmul.mubr.msk.f32.gmra.mrb[24].mxu0 %vm409_vm2, %v2297_v28  ;;  %4918 = vmatprep.mubr.msk.f32.mxu1 %vm409_vm2, %v5800_v47  ;;  %7260 = vst [vmem:[#allocation67_spill] sm:$0xff] %v6424_v57  ;;  %v6427_v28 = vld [vmem:[%s5675_s27 + $0x190] sm:$0x3]  ;;  %v6441_v32 = vsel %vm995_vm3, %v2308_v56, %v6424_v57  ;;  %v6462_v56 = vld [vmem:[%s7098_s1 + $0x20] sm:$0xf] }
  0x71   : > { %5142 = vmatprep.mubr.msk.f32.mxu0 %vm409_vm2, %v6393_v60  ;;  %7261 = vst [vmem:[#allocation68_spill] sm:$0xff] %v6427_v28  ;;  %v2311_v9 = vrot.slane %v6427_v28, 2  ;;  %7262 = vst [vmem:[#allocation69_spill] sm:$0xff] %v6441_v32 }
  0x73   : > { %4919 = vmatmul.mubr.msk.f32.gmra.mrb[10].mxu1 %vm409_vm2, %v5803_v48 }
  0x74   : > { %5143 = vmatmul.mubr.msk.f32.gmra.mrb[26].mxu0 %vm409_vm2, %v2302_v0  ;;  %4921 = vmatprep.mubr.msk.f32.mxu1 %vm409_vm2, %v5832_v58  ;;  %v2312_v0 = vsel %vm995_vm3, %v6424_v57, %v2311_v9  ;;  %v7286_v57 = vld [vmem:[#allocation33_spill] sm:$0xff] }
  0x75   : > { %5145 = vmatprep.mubr.msk.f32.mxu0 %vm409_vm2, %v6420_v30 }
  0x77   : > { %4922 = vmatmul.mubr.msk.f32.gmra.mrb[12].mxu1 %vm409_vm2, %v5835_v59 }
  0x78   : > { %5146 = vmatmul.mubr.msk.f32.gmra.mrb[28].mxu0 %vm409_vm2, %v2307_v49  ;;  %4924 = vmatprep.mubr.msk.f32.mxu1 %vm409_vm2, %v5871_v11  ;;  %v7268_v49 = vld [vmem:[#allocation39_spill] sm:$0xff] }
  0x79   : > { %5148 = vmatprep.mubr.msk.f32.mxu0 %vm409_vm2, %v6441_v32  ;;  %v1059_v32 = vrot.slane %v7286_v57, 2 }
  0x7b   : > { %4925 = vmatmul.mubr.msk.f32.gmra.mrb[14].mxu1 %vm409_vm2, %v5874_v12 }
  0x7c   : > { %5149 = vmatmul.mubr.msk.f32.gmra.mrb[30].mxu0 %vm409_vm2, %v2312_v0  ;;  %4927 = vmatprep.mubr.msk.f32.mxu1 %vm409_vm2, %v5903_v33  ;;  %v7269_v0 = vld [vmem:[#allocation20_spill] sm:$0xff] }
  0x7d   : > { %5153 = vmatprep.mubr.msk.f32.mxu0 %vm409_vm2, %v5725_v18 }
  0x7f   : > { %4928 = vmatmul.mubr.msk.f32.gmra.mrb[16].mxu1 %vm409_vm2, %v5906_v37 }
  0x80   : > { %5154 = vmatmul.mubr.msk.f32.vlgmr.msra.gmra.mrb[0].mxu0 %vm409_vm2, %v5728_v19  ;;  %4930 = vmatprep.mubr.msk.f32.mxu1 %vm409_vm2, %v5965_v26  ;;  %v996_v19 = vrot.slane %v5686_v3, 2 }
  0x81   : > { %5202 = vmatpush3.msk.msra.mxu0 %vm474_vm0, %v6045_v42  ;;  %5156 = vmatprep.mubr.msk.f32.mxu0 %vm409_vm2, %v5731_v20  ;;  %v997_v20 = vrot.slane %v5692_v4, 2  ;;  %v1014_v4 = vrot.slane %v5794_v45, 2  ;;  %v7264_v42 = vld [vmem:[#allocation35_spill] sm:$0xff] }
  0x82   : > { %5251 = vmatprep.subr.msk.mxu0 %vm474_vm0, %v6462_v56  ;;  %v7265_v45 = vld [vmem:[#allocation31_spill] sm:$0xff] }
  0x83   : > { %4931 = vmatmul.mubr.msk.f32.gmra.mrb[18].mxu1 %vm409_vm2, %v5968_v38 }
  0x84   : > { %5157 = vmatmul.mubr.msk.f32.gmra.mrb[2].mxu0 %vm409_vm2, %v5743_v25  ;;  %4933 = vmatprep.mubr.msk.f32.mxu1 %vm409_vm2, %v5994_v50  ;;  %v999_v25 = vrot.slane %v5716_v13, 2  ;;  %v7263_v13 = vld [vmem:[#allocation11_spill] sm:$0xff] }
  0x85   : > { %5159 = vmatprep.mubr.msk.f32.mxu0 %vm409_vm2, %v5770_v36  ;;  %v998_v36 = vsel %vm995_vm3, %v996_v19, %v997_v20  ;;  %v1034_v19 = vrot.slane %v7269_v0, 2  ;;  %v6634_v0 = vld [vmem:[%s5675_s27 + $0x70] sm:$0x3] }
  0x86   : > { %v1000_v3 = vsel %vm995_vm3, %v997_v20, %v999_v25  ;;  %v6598_v20 = vld [vmem:[%s5675_s27 + $0x198] sm:$0xff]  ;;  %v6601_v25 = vld [vmem:[%s5675_s27 + $0x40] sm:$0x3] }
  0x87   : > { %4934 = vmatmul.mubr.msk.f32.gmra.mrb[20].mxu1 %vm409_vm2, %v5997_v22 }
  0x88   : > { %5160 = vmatmul.mubr.msk.f32.gmra.mrb[4].mxu0 %vm409_vm2, %v5778_v40  ;;  %4936 = vmatprep.mubr.msk.f32.mxu1 %vm409_vm2, %v6037_v44  ;;  %v1019_v40 = vrot.slane %v7263_v13, 2  ;;  %v3067_v13 = vrot.slane %v6601_v25, 1 }
  0x89   : > { %5162 = vmatprep.mubr.msk.f32.mxu0 %vm409_vm2, %v5800_v47 }
  0x8b   : > { %4937 = vmatmul.mubr.msk.f32.gmra.mrb[22].mxu1 %vm409_vm2, %v6040_v53 }
  0x8c   : > { %5163 = vmatmul.mubr.msk.f32.gmra.mrb[6].mxu0 %vm409_vm2, %v5803_v48  ;;  %4939 = vmatprep.mubr.msk.f32.mxu1 %vm409_vm2, %v6081_v43 }
  0x8d   : > { %5165 = vmatprep.mubr.msk.f32.mxu0 %vm409_vm2, %v5832_v58 }
  0x8f   : > { %4940 = vmatmul.mubr.msk.f32.gmra.mrb[24].mxu1 %vm409_vm2, %v6084_v29 }
  0x90   : > { %5166 = vmatmul.mubr.msk.f32.gmra.mrb[8].mxu0 %vm409_vm2, %v5835_v59  ;;  %4942 = vmatprep.mubr.msk.f32.mxu1 %vm409_vm2, %v6120_v27 }
  0x91   : > { %5168 = vmatprep.mubr.msk.f32.mxu0 %vm409_vm2, %v5871_v11 }
  0x93   : > { %4943 = vmatmul.mubr.msk.f32.gmra.mrb[26].mxu1 %vm409_vm2, %v6125_v54 }
  0x94   : > { %5169 = vmatmul.mubr.msk.f32.gmra.mrb[10].mxu0 %vm409_vm2, %v5874_v12  ;;  %4945 = vmatprep.mubr.msk.f32.mxu1 %vm409_vm2, %v6159_v6 }
  0x95   : > { %5171 = vmatprep.mubr.msk.f32.mxu0 %vm409_vm2, %v5903_v33 }
  0x97   : > { %4946 = vmatmul.mubr.msk.f32.gmra.mrb[28].mxu1 %vm409_vm2, %v6162_v51 }
  0x98   : > { %5172 = vmatmul.mubr.msk.f32.gmra.mrb[12].mxu0 %vm409_vm2, %v5906_v37  ;;  %4948 = vmatprep.mubr.msk.f32.mxu1 %vm409_vm2, %v6204_v24 }
  0x99   : > { %5174 = vmatprep.mubr.msk.f32.mxu0 %vm409_vm2, %v5965_v26 }
  0x9b   : > { %4949 = vmatmul.mubr.msk.f32.gmra.mrb[30].mxu1 %vm409_vm2, %v6207_v61 }
  0x9c   : > { %5175 = vmatmul.mubr.msk.f32.gmra.mrb[14].mxu0 %vm409_vm2, %v5968_v38  ;;  %4953 = vmatprep.mubr.msk.f32.mxu1 %vm409_vm2, %v998_v36  ;;  %v1035_v36 = vsel %vm995_vm3, %v6190_v5, %v1034_v19 }
  0x9d   : > { %5177 = vmatprep.mubr.msk.f32.mxu0 %vm409_vm2, %v5994_v50 }
  0x9f   : > { %4954 = vmatmul.mubr.msk.f32.vlgmr.msra.gmra.mrb[0].mxu1 %vm409_vm2, %v1000_v3  ;;  %v6613_v3 = vld [vmem:[%s5675_s27 + $0x1a0] sm:$0xff] }
  0xa0   : > { %5178 = vmatmul.mubr.msk.f32.gmra.mrb[16].mxu0 %vm409_vm2, %v5997_v22  ;;  %5002 = vmatpush3.msk.msra.mxu1 %vm474_vm0, %v6312_v7  ;;  %v7267_v7 = vld [vmem:[#allocation17_spill] sm:$0xff] }
  0xa1   : > { %4956 = vmatprep.mubr.msk.f32.mxu1 %vm409_vm2, %v5987_v14  ;;  %5180 = vmatprep.mubr.msk.f32.mxu0 %vm409_vm2, %v6037_v44  ;;  %v7266_v14 = vld [vmem:[#allocation14_spill] sm:$0xff]  ;;  %v1029_v8 = vrot.slane %v7267_v7, 2  ;;  %v7273_v7 = vld [vmem:[#allocation23_spill] sm:$0xff] }
  0xa2   : > { %5301 = vmatprep.subr.msk.mxu1 %vm474_vm0, %v5683_v2  ;;  %v1015_v2 = vsel %vm995_vm3, %v6021_v39, %v1014_v4  ;;  %v7270_v4 = vld [vmem:[#allocation21_spill] sm:$0xff] }
  0xa3   : > { %4957 = vmatmul.mubr.msk.f32.gmra.mrb[2].mxu1 %vm409_vm2, %v6166_v17  ;;  %v1024_v17 = vrot.slane %v7266_v14, 2  ;;  %v1030_v9 = vsel %vm995_vm3, %v7268_v49, %v1029_v8  ;;  %v1044_v8 = vrot.slane %v7273_v7, 2  ;;  %v7279_v7 = vld [vmem:[#allocation50_spill] sm:$0xff] }
  0xa4   : > { %5181 = vmatmul.mubr.msk.f32.gmra.mrb[18].mxu0 %vm409_vm2, %v6040_v53  ;;  %4959 = vmatprep.mubr.msk.f32.mxu1 %vm409_vm2, %v6034_v16  ;;  %v1020_v16 = vsel %vm995_vm3, %v7265_v45, %v1019_v40  ;;  %v6618_v40 = vld [vmem:[%s5675_s27 + $0x58] sm:$0x3] }
  0xa5   : > { %5183 = vmatprep.mubr.msk.f32.mxu0 %vm409_vm2, %v6081_v43  ;;  %v1045_v19 = vsel %vm995_vm3, %v6262_v21, %v1044_v8 }
  0xa7   : > { %4960 = vmatmul.mubr.msk.f32.gmra.mrb[4].mxu1 %vm409_vm2, %v6170_v31  ;;  %v1025_v31 = vsel %vm995_vm3, %v6106_v52, %v1024_v17  ;;  %v7272_v17 = vld [vmem:[#allocation4_spill] sm:$0xff] }
  0xa8   : > { %5184 = vmatmul.mubr.msk.f32.gmra.mrb[20].mxu0 %vm409_vm2, %v6084_v29  ;;  %4962 = vmatprep.mubr.msk.f32.mxu1 %vm409_vm2, %v6068_v55 }
  0xa9   : > { %5186 = vmatprep.mubr.msk.f32.mxu0 %vm409_vm2, %v6120_v27 }
  0xab   : > { %4963 = vmatmul.mubr.msk.f32.gmra.mrb[6].mxu1 %vm409_vm2, %v1015_v2  ;;  %v1039_v2 = vrot.slane %v7270_v4, 2 }
  0xac   : > { %5187 = vmatmul.mubr.msk.f32.gmra.mrb[22].mxu0 %vm409_vm2, %v6125_v54  ;;  %4965 = vmatprep.mubr.msk.f32.mxu1 %vm409_vm2, %v7264_v42 }
  0xad   : > { %5189 = vmatprep.mubr.msk.f32.mxu0 %vm409_vm2, %v6159_v6  ;;  %v1040_v14 = vsel %vm995_vm3, %v6235_v10, %v1039_v2  ;;  %v7275_v2 = vld [vmem:[#allocation26_spill] sm:$0xff] }
  0xaf   : > { %4966 = vmatmul.mubr.msk.f32.gmra.mrb[8].mxu1 %vm409_vm2, %v1020_v16  ;;  %v7271_v16 = vld [vmem:[#allocation5_spill] sm:$0xff] }
  0xb0   : > { %5190 = vmatmul.mubr.msk.f32.gmra.mrb[24].mxu0 %vm409_vm2, %v6162_v51  ;;  %4968 = vmatprep.mubr.msk.f32.mxu1 %vm409_vm2, %v6144_v23 }
  0xb1   : > { %5192 = vmatprep.mubr.msk.f32.mxu0 %vm409_vm2, %v6204_v24 }
  0xb3   : > { %4969 = vmatmul.mubr.msk.f32.gmra.mrb[10].mxu1 %vm409_vm2, %v1025_v31  ;;  %v3068_v31 = vsel %vm326_vm1, %v7272_v17, %v3067_v13  ;;  %v1049_v13 = vrot.slane %v7275_v2, 2  ;;  %v6651_v17 = vld [vmem:[%s5675_s27 + $0x88] sm:$0x3] }
  0xb4   : > { %5193 = vmatmul.mubr.msk.f32.gmra.mrb[26].mxu0 %vm409_vm2, %v6207_v61  ;;  %4971 = vmatprep.mubr.msk.f32.mxu1 %vm409_vm2, %v6201_v62  ;;  %v7281_v2 = vld [vmem:[#allocation28_spill] sm:$0xff]  ;;  %v3082_v28 = vrot.slane %v6651_v17, 1 }
  0xb5   : > { %5195 = vmatprep.mubr.msk.f32.mxu0 %vm409_vm2, %v6403_v63  ;;  %v1050_v8 = vsel %vm995_vm3, %v7279_v7, %v1049_v13  ;;  %v7284_v13 = vld [vmem:[#allocation51_spill] sm:$0xff] }
  0xb7   : > { %4972 = vmatmul.mubr.msk.f32.gmra.mrb[12].mxu1 %vm409_vm2, %v1030_v9  ;;  %v3072_v9 = vrot.slane %v6618_v40, 1 }
  0xb8   : > { %5196 = vmatmul.mubr.msk.f32.gmra.mrb[28].mxu0 %vm409_vm2, %v6406_v35  ;;  %4974 = vmatprep.mubr.msk.f32.mxu1 %vm409_vm2, %v6226_v1 }
  0xb9   : > { %5198 = vmatprep.mubr.msk.f32.mxu0 %vm409_vm2, %v6598_v20 }
  0xbb   : > { %4975 = vmatmul.mubr.msk.f32.gmra.mrb[14].mxu1 %vm409_vm2, %v1035_v36  ;;  %v7274_v36 = vld [vmem:[#allocation6_spill] sm:$0xff] }
  0xbc   : > { %5199 = vmatmul.mubr.msk.f32.gmra.mrb[30].mxu0 %vm409_vm2, %v6613_v3  ;;  %4977 = vmatprep.mubr.msk.f32.mxu1 %vm409_vm2, %v6258_v41  ;;  %v3073_v4 = vsel %vm326_vm1, %v7274_v36, %v3072_v9  ;;  %v7280_v9 = vld [vmem:[#allocation8_spill] sm:$0xff] }
  0xbd   : > { %5203 = vmatprep.mubr.msk.f32.mxu0 %vm409_vm2, %v7271_v16  ;;  %v3077_v16 = vrot.slane %v6634_v0, 1 }
  0xbf   : > { %4978 = vmatmul.mubr.msk.f32.gmra.mrb[16].mxu1 %vm409_vm2, %v1040_v14  ;;  %v7276_v14 = vld [vmem:[#allocation7_spill] sm:$0xff]  ;;  %v3078_v36 = vsel %vm326_vm1, %v7280_v9, %v3077_v16  ;;  %v7285_v9 = vld [vmem:[#allocation10_spill] sm:$0xff] }
  0xc0   : > { %5204 = vmatmul.mubr.msk.f32.vlgmr.msra.gmra.mrb[0].mxu0 %vm409_vm2, %v3068_v31  ;;  %4980 = vmatprep.mubr.msk.f32.mxu1 %vm409_vm2, %v6280_v46  ;;  %v7278_v31 = vld [vmem:[#allocation9_spill] sm:$0xff] }
  0xc1   : > { %5252 = vmatpush3.msk.msra.mxu0 %vm474_vm0, %v6462_v56  ;;  %5206 = vmatprep.mubr.msk.f32.mxu0 %vm409_vm2, %v7276_v14  ;;  %v7277_v56 = vld [vmem:[#allocation53_spill] sm:$0xff]  ;;  %v1054_v14 = vrot.slane %v7281_v2, 2  ;;  %v3083_v2 = vsel %vm326_vm1, %v7285_v9, %v3082_v28 }
  0xc2   : > { %v7290_v9 = vld [vmem:[#allocation13_spill] sm:$0xff] }
  0xc3   : > { %4981 = vmatmul.mubr.msk.f32.gmra.mrb[18].mxu1 %vm409_vm2, %v1045_v19  ;;  %v6666_v19 = vld [vmem:[%s5675_s27 + $0xa0] sm:$0x3]  ;;  %v1055_v16 = vsel %vm995_vm3, %v7284_v13, %v1054_v14  ;;  %v7291_v13 = vld [vmem:[#allocation37_spill] sm:$0xff] }
  0xc4   : > { %5207 = vmatmul.mubr.msk.f32.gmra.mrb[2].mxu0 %vm409_vm2, %v3073_v4  ;;  %4983 = vmatprep.mubr.msk.f32.mxu1 %vm409_vm2, %v7277_v56  ;;  %v7282_v4 = vld [vmem:[#allocation54_spill] sm:$0xff]  ;;  %v3087_v7 = vrot.slane %v6666_v19, 1  ;;  %v7289_v14 = vld [vmem:[#allocation55_spill] sm:$0xff] }
  0xc5   : > { %5209 = vmatprep.mubr.msk.f32.mxu0 %vm409_vm2, %v7278_v31  ;;  %v7283_v31 = vld [vmem:[#allocation12_spill] sm:$0xff]  ;;  %v1060_v28 = vsel %vm995_vm3, %v7289_v14, %v1059_v32  ;;  %v7294_v32 = vld [vmem:[#allocation58_spill] sm:$0xff]  ;;  %v7296_v14 = vld [vmem:[#allocation41_spill] sm:$0xff] }
  0xc6   : > { %v3088_v57 = vsel %vm326_vm1, %v7290_v9, %v3087_v7  ;;  %v7295_v9 = vld [vmem:[#allocation16_spill] sm:$0xff] }
  0xc7   : > { %4984 = vmatmul.mubr.msk.f32.gmra.mrb[20].mxu1 %vm409_vm2, %v1050_v8  ;;  %v6681_v8 = vld [vmem:[%s5675_s27 + $0xb8] sm:$0x3] }
  0xc8   : > { %5210 = vmatmul.mubr.msk.f32.gmra.mrb[4].mxu0 %vm409_vm2, %v3078_v36  ;;  %4986 = vmatprep.mubr.msk.f32.mxu1 %vm409_vm2, %v7282_v4  ;;  %v7287_v36 = vld [vmem:[#allocation57_spill] sm:$0xff]  ;;  %v1064_v4 = vrot.slane %v7291_v13, 2  ;;  %v3092_v56 = vrot.slane %v6681_v8, 1 }
  0xc9   : > { %5212 = vmatprep.mubr.msk.f32.mxu0 %vm409_vm2, %v7283_v31  ;;  %v7288_v31 = vld [vmem:[#allocation15_spill] sm:$0xff] }
  0xca   : > { %v1065_v7 = vsel %vm995_vm3, %v7294_v32, %v1064_v4  ;;  %v3093_v13 = vsel %vm326_vm1, %v7295_v9, %v3092_v56  ;;  %v7298_v4 = vld [vmem:[#allocation19_spill] sm:$0xff] }
  0xcb   : > { %4987 = vmatmul.mubr.msk.f32.gmra.mrb[22].mxu1 %vm409_vm2, %v1055_v16  ;;  %v6696_v16 = vld [vmem:[%s5675_s27 + $0xd0] sm:$0x3]  ;;  %v6726_v32 = vld [vmem:[%s5675_s27 + $0x100] sm:$0x3] }
  0xcc   : > { %5213 = vmatmul.mubr.msk.f32.gmra.mrb[6].mxu0 %vm409_vm2, %v3083_v2  ;;  %4989 = vmatprep.mubr.msk.f32.mxu1 %vm409_vm2, %v7287_v36  ;;  %v7292_v2 = vld [vmem:[#allocation60_spill] sm:$0xff]  ;;  %v1069_v36 = vrot.slane %v7296_v14, 2  ;;  %v3097_v21 = vrot.slane %v6696_v16, 1 }
  0xcd   : > { %5215 = vmatprep.mubr.msk.f32.mxu0 %vm409_vm2, %v7288_v31  ;;  %v7293_v31 = vld [vmem:[#allocation18_spill] sm:$0xff] }
  0xce   : > { %v1070_v56 = vsel %vm995_vm3, %v6376_v34, %v1069_v36  ;;  %v3098_v14 = vsel %vm326_vm1, %v7298_v4, %v3097_v21  ;;  %v7301_v36 = vld [vmem:[#allocation24_spill] sm:$0xff]  ;;  %v3107_v4 = vrot.slane %v6726_v32, 1 }
  0xcf   : > { %4990 = vmatmul.mubr.msk.f32.gmra.mrb[24].mxu1 %vm409_vm2, %v1060_v28  ;;  %v6711_v28 = vld [vmem:[%s5675_s27 + $0xe8] sm:$0x3]  ;;  %v5586_v34 = vld [vmem:[%s5675_s27 + $0x20] sm:$0xff] }
  0xd0   : > { %5216 = vmatmul.mubr.msk.f32.gmra.mrb[8].mxu0 %vm409_vm2, %v3088_v57  ;;  %4992 = vmatprep.mubr.msk.f32.mxu1 %vm409_vm2, %v7292_v2  ;;  %v7297_v57 = vld [vmem:[#allocation22_spill] sm:$0xff] }
  0xd1   : > { %5218 = vmatprep.mubr.msk.f32.mxu0 %vm409_vm2, %v7293_v31  ;;  %v7299_v31 = vld [vmem:[#allocation45_spill] sm:$0xff]  ;;  %v5589_v2 = vld [vmem:[%s5675_s27 + $0x38] sm:$0xff] }
  0xd2   : > { %v1074_v9 = vrot.slane %v7299_v31, 2  ;;  %v6740_v31 = vld [vmem:[%s5675_s27 + $0x118] sm:$0x3] }
  0xd3   : > { %4993 = vmatmul.mubr.msk.f32.gmra.mrb[26].mxu1 %vm409_vm2, %v1065_v7  ;;  %v3102_v7 = vrot.slane %v6711_v28, 1 }
  0xd4   : > { %5219 = vmatmul.mubr.msk.f32.gmra.mrb[10].mxu0 %vm409_vm2, %v3093_v13  ;;  %4995 = vmatprep.mubr.msk.f32.mxu1 %vm409_vm2, %v6393_v60  ;;  %v7300_v13 = vld [vmem:[#allocation27_spill] sm:$0xff]  ;;  %v1075_v21 = vsel %vm995_vm3, %v6397_v15, %v1074_v9  ;;  %v7303_v9 = vld [vmem:[#allocation25_spill] sm:$0xff]  ;;  %v3112_v15 = vrot.slane %v6740_v31, 1 }
  0xd5   : > { %5221 = vmatprep.mubr.msk.f32.mxu0 %vm409_vm2, %v7297_v57  ;;  %v3103_v57 = vsel %vm326_vm1, %v7301_v36, %v3102_v7  ;;  %v3108_v7 = vsel %vm326_vm1, %v7303_v9, %v3107_v4  ;;  %v7305_v4 = vld [vmem:[#allocation30_spill] sm:$0xff] }
  0xd6   : > { %v5591_v9 = vld [vmem:[%s5675_s27 + $0x50] sm:$0xff] }
  0xd7   : > { %4996 = vmatmul.mubr.msk.f32.gmra.mrb[28].mxu1 %vm409_vm2, %v1070_v56  ;;  %v5585_v56 = vld [vmem:[%s5675_s27 + $0x18] sm:$0xff] }
  0xd8   : > { %5222 = vmatmul.mubr.msk.f32.gmra.mrb[12].mxu0 %vm409_vm2, %v3098_v14  ;;  %4998 = vmatprep.mubr.msk.f32.mxu1 %vm409_vm2, %v6420_v30  ;;  %v7302_v14 = vld [vmem:[#allocation29_spill] sm:$0xff] }
  0xd9   : > { %5224 = vmatprep.mubr.msk.f32.mxu0 %vm409_vm2, %v7300_v13  ;;  %v6752_v30 = vld [vmem:[%s5675_s27 + $0x130] sm:$0x3] }
  0xda   : > { %7304 = vst [vmem:[#allocation11_spill] sm:$0xff] %v6752_v30  ;;  %v3117_v60 = vrot.slane %v6752_v30, 1  ;;  %v6782_v30 = vld [vmem:[%s5675_s27 + $0x160] sm:$0x3] }
  0xdb   : > { %4999 = vmatmul.mubr.msk.f32.gmra.mrb[30].mxu1 %vm409_vm2, %v1075_v21  ;;  %v5587_v21 = vld [vmem:[%s7098_s1 + $0x10] sm:$0xf] }
  0xdc   : > { %5225 = vmatmul.mubr.msk.f32.gmra.mrb[14].mxu0 %vm409_vm2, %v3103_v57  ;;  %5003 = vmatprep.mubr.msk.f32.mxu1 %vm409_vm2, %v5585_v56  ;;  %v5588_v57 = vld [vmem:[%s5675_s27 + $0x30] sm:$0xff]  ;;  %v3113_v56 = vsel %vm326_vm1, %v7305_v4, %v3112_v15  ;;  %v7309_v15 = vld [vmem:[#allocation32_spill] sm:$0xff] }
  0xdd   : > { %5227 = vmatprep.mubr.msk.f32.mxu0 %vm409_vm2, %v7302_v14  ;;  %v3118_v4 = vsel %vm326_vm1, %v7309_v15, %v3117_v60  ;;  %v3127_v60 = vrot.slane %v6782_v30, 1  ;;  %v6795_v15 = vld [vmem:[%s5675_s27 + $0x178] sm:$0x3] }
  0xde   : > { %7312 = vst [vmem:[#allocation31_spill] sm:$0xff] %v6795_v15 }
  0xdf   : > { %5004 = vmatmul.mubr.msk.f32.vlgmr.msra.gmra.mrb[0].mxu1 %vm409_vm2, %v5586_v34  ;;  %v7306_v34 = vld [vmem:[#allocation34_spill] sm:$0xff] }
  0xe0   : > { %5228 = vmatmul.mubr.msk.f32.gmra.mrb[16].mxu0 %vm409_vm2, %v3108_v7  ;;  %5302 = vmatpush3.msk.msra.mxu1 %vm474_vm0, %v5587_v21  ;;  %v6769_v7 = vld [vmem:[%s5675_s27 + $0x148] sm:$0x3] }
  0xe1   : > { %5006 = vmatprep.mubr.msk.f32.mxu1 %vm409_vm2, %v5588_v57  ;;  %5230 = vmatprep.mubr.msk.f32.mxu0 %vm409_vm2, %v7306_v34  ;;  %7307 = vst [vmem:[#allocation35_spill] sm:$0xff] %v6769_v7  ;;  %v5590_v21 = vld [vmem:[%s5675_s27 + $0x48] sm:$0xff]  ;;  %v3122_v34 = vrot.slane %v6769_v7, 1 }
  0xe2   : > { %v7308_v57 = vld [vmem:[#allocation36_spill] sm:$0xff] }
  0xe3   : > { %5007 = vmatmul.mubr.msk.f32.gmra.mrb[2].mxu1 %vm409_vm2, %v5589_v2  ;;  %v5593_v7 = vld [vmem:[%s5675_s27 + $0x68] sm:$0xff] }
  0xe4   : > { %5231 = vmatmul.mubr.msk.f32.gmra.mrb[18].mxu0 %vm409_vm2, %v3113_v56  ;;  %5009 = vmatprep.mubr.msk.f32.mxu1 %vm409_vm2, %v5590_v21  ;;  %v5592_v56 = vld [vmem:[%s5675_s27 + $0x60] sm:$0xff]  ;;  %v7310_v21 = vld [vmem:[#allocation42_spill] sm:$0xff] }
  0xe5   : > { %5233 = vmatprep.mubr.msk.f32.mxu0 %vm409_vm2, %v7308_v57  ;;  %v7311_v57 = vld [vmem:[#allocation38_spill] sm:$0xff] }
  0xe6   : > { %v3123_v14 = vsel %vm326_vm1, %v7311_v57, %v3122_v34  ;;  %v3132_v34 = vrot.slane %v6795_v15, 1  ;;  %v3134_v57 = vrot.slane %v6403_v63, 1  ;;  %v3140_v15 = vrot.slane %v6613_v3, 1 }
  0xe7   : > { %5010 = vmatmul.mubr.msk.f32.gmra.mrb[4].mxu1 %vm409_vm2, %v5591_v9  ;;  %v7313_v9 = vld [vmem:[#allocation43_spill] sm:$0xff] }
  0xe8   : > { %5234 = vmatmul.mubr.msk.f32.gmra.mrb[20].mxu0 %vm409_vm2, %v3118_v4  ;;  %5012 = vmatprep.mubr.msk.f32.mxu1 %vm409_vm2, %v5592_v56  ;;  %v7314_v4 = vld [vmem:[#allocation40_spill] sm:$0xff] }
  0xe9   : > { %5236 = vmatprep.mubr.msk.f32.mxu0 %vm409_vm2, %v7310_v21  ;;  %v3128_v56 = vsel %vm326_vm1, %v7314_v4, %v3127_v60  ;;  %v6809_v21 = vrot.slane %v6406_v35, 1 }
  0xeb   : > { %5013 = vmatmul.mubr.msk.f32.gmra.mrb[6].mxu1 %vm409_vm2, %v5593_v7  ;;  %v6812_v7 = vld [vmem:[%s5675_s27 + $0x190] sm:$0x3] }
  0xec   : > { %5237 = vmatmul.mubr.msk.f32.gmra.mrb[22].mxu0 %vm409_vm2, %v3123_v14  ;;  %5015 = vmatprep.mubr.msk.f32.mxu1 %vm409_vm2, %v5800_v47  ;;  %v7315_v47 = vld [vmem:[#allocation46_spill] sm:$0xff]  ;;  %v7316_v14 = vld [vmem:[#allocation44_spill] sm:$0xff]  ;;  %v3137_v4 = vrot.slane %v6812_v7, 1 }
  0xed   : > { %5239 = vmatprep.mubr.msk.f32.mxu0 %vm409_vm2, %v7313_v9  ;;  %v3133_v60 = vsel %vm326_vm1, %v7316_v14, %v3132_v34  ;;  %v3139_v9 = vrot.slane %v6598_v20, 1  ;;  %v3471_v14 = vrot.slane %v5589_v2, 2  ;;  %v7332_v2 = vld [vmem:[#allocation55_spill] sm:$0xff] }
  0xef   : > { %5016 = vmatmul.mubr.msk.f32.gmra.mrb[8].mxu1 %vm409_vm2, %v5803_v48  ;;  %v6828_v48 = vsel %vm326_vm1, %v3134_v57, %v6809_v21  ;;  %v3141_v57 = vsel %vm326_vm1, %v3139_v9, %v3140_v15  ;;  %v7336_v9 = vld [vmem:[#allocation60_spill] sm:$0xff] }
  0xf0   : > { %5240 = vmatmul.mubr.msk.f32.gmra.mrb[24].mxu0 %vm409_vm2, %v3128_v56  ;;  %5018 = vmatprep.mubr.msk.f32.mxu1 %vm409_vm2, %v5832_v58  ;;  %v6831_v56 = vld [vmem:[%s5675_s27 + $0x1a8] sm:$0x3]  ;;  %v3138_v58 = vsel %vm326_vm1, %v6809_v21, %v3137_v4  ;;  %v7317_v4 = vrot.slane %v5725_v18, 2 }
  0xf1   : > { %5242 = vmatprep.mubr.msk.f32.mxu0 %vm409_vm2, %v7315_v47  ;;  %v3142_v34 = vrot.slane %v6831_v56, 1 }
  0xf3   : > { %5019 = vmatmul.mubr.msk.f32.gmra.mrb[10].mxu1 %vm409_vm2, %v5835_v59  ;;  %v3143_v59 = vsel %vm326_vm1, %v3140_v15, %v3142_v34  ;;  %v7335_v15 = vld [vmem:[#allocation36_spill] sm:$0xff]  ;;  %v7338_v34 = vld [vmem:[#allocation58_spill] sm:$0xff] }
  0xf4   : > { %5243 = vmatmul.mubr.msk.f32.gmra.mrb[26].mxu0 %vm409_vm2, %v3133_v60  ;;  %5021 = vmatprep.mubr.msk.f32.mxu1 %vm409_vm2, %v5871_v11  ;;  %v3473_v11 = vrot.slane %v6601_v25, 2  ;;  %v3472_v60 = vsel %vm995_vm3, %v7317_v4, %v3471_v14  ;;  %v3533_v4 = vrot.slane %v6782_v30, 2 }
  0xf5   : > { %5245 = vmatprep.mubr.msk.f32.mxu0 %vm409_vm2, %v6828_v48 }
  0xf7   : > { %5022 = vmatmul.mubr.msk.f32.gmra.mrb[12].mxu1 %vm409_vm2, %v5874_v12  ;;  %v3474_v12 = vsel %vm995_vm3, %v3471_v14, %v3473_v11  ;;  %v7337_v14 = vld [vmem:[#allocation32_spill] sm:$0xff] }
  0xf8   : > { %5246 = vmatmul.mubr.msk.f32.gmra.mrb[28].mxu0 %vm409_vm2, %v3138_v58  ;;  %5024 = vmatprep.mubr.msk.f32.mxu1 %vm409_vm2, %v5903_v33  ;;  %v3478_v33 = vrot.slane %v6618_v40, 2  ;;  %v7328_v40 = vld [vmem:[#allocation11_spill] sm:$0xff] }
  0xf9   : > { %5248 = vmatprep.mubr.msk.f32.mxu0 %vm409_vm2, %v3141_v57 }
  0xfa   : > { %v3479_v18 = vsel %vm995_vm3, %v6021_v39, %v3478_v33  ;;  %v7342_v33 = vld [vmem:[#allocation38_spill] sm:$0xff] }
  0xfb   : > { %5025 = vmatmul.mubr.msk.f32.gmra.mrb[14].mxu1 %vm409_vm2, %v5906_v37  ;;  %v3483_v37 = vrot.slane %v6634_v0, 2  ;;  %v3523_v0 = vrot.slane %v7328_v40, 2 }
  0xfc   : > { %5249 = vmatmul.mubr.msk.f32.gmra.mrb[30].mxu0 %vm409_vm2, %v3143_v59  ;;  %5027 = vmatprep.mubr.msk.f32.mxu1 %vm409_vm2, %v5965_v26  ;;  %v3488_v26 = vrot.slane %v6651_v17, 2  ;;  %v7329_v17 = vld [vmem:[#allocation34_spill] sm:$0xff]  ;;  %v7339_v59 = vld [vmem:[#allocation59_spill] sm:$0xff] }
  0xfd   : > { %5253 = vmatprep.mubr.msk.f32.mxu0 %vm409_vm2, %v3472_v60  ;;  %v1890_v11 = vrot.slane %v7339_v59, 1  ;;  %v7340_v60 = vld [vmem:[#allocation42_spill] sm:$0xff] }
  0xff   : > { %5028 = vmatmul.mubr.msk.f32.gmra.mrb[16].mxu1 %vm409_vm2, %v5968_v38  ;;  %v3498_v38 = vrot.slane %v6681_v8, 2  ;;  %v7331_v8 = vld [vmem:[#allocation30_spill] sm:$0xff] }
 0x100   : > { %5254 = vmatmul.mubr.msk.f32.vlgmr.msra.gmra.mrb[0].mxu0 %vm409_vm2, %v3474_v12  ;;  %5030 = vmatprep.mubr.msk.f32.mxu1 %vm409_vm2, %v5994_v50  ;;  %v3484_v50 = vsel %vm995_vm3, %v7265_v45, %v3483_v37  ;;  %v7341_v12 = vld [vmem:[#allocation63_spill] sm:$0xff]  ;;  %v7343_v37 = vld [vmem:[#allocation61_spill] sm:$0xff] }
 0x101   : > { %5256 = vmatprep.mubr.msk.f32.mxu0 %vm409_vm2, %v6068_v55  ;;  %v3499_v39 = vsel %vm995_vm3, %v6190_v5, %v3498_v38  ;;  %v7318_v55 = vld [vmem:[#allocation48_spill] sm:$0xff]  ;;  %v7321_v5 = vld [vmem:[#allocation50_spill] sm:$0xff] }
 0x102   : > { %v7347_v38 = vld [vmem:[#allocation66_spill] sm:$0xff] }
 0x103   : > { %5031 = vmatmul.mubr.msk.f32.gmra.mrb[18].mxu1 %vm409_vm2, %v5997_v22  ;;  %v3493_v22 = vrot.slane %v6666_v19, 2  ;;  %v7330_v19 = vld [vmem:[#allocation57_spill] sm:$0xff] }
 0x104   : > { %5257 = vmatmul.mubr.msk.f32.gmra.mrb[2].mxu0 %vm409_vm2, %v3479_v18  ;;  %5033 = vmatprep.mubr.msk.f32.mxu1 %vm409_vm2, %v6037_v44  ;;  %v3489_v44 = vsel %vm995_vm3, %v6106_v52, %v3488_v26  ;;  %v1891_v18 = vsel %vm326_vm1, %v7342_v33, %v1890_v11  ;;  %v7344_v26 = vld [vmem:[#allocation62_spill] sm:$0xff] }
 0x105   : > { %5259 = vmatprep.mubr.msk.f32.mxu0 %vm409_vm2, %v7264_v42  ;;  %v7326_v42 = vld [vmem:[#allocation51_spill] sm:$0xff] }
 0x107   : > { %5034 = vmatmul.mubr.msk.f32.gmra.mrb[20].mxu1 %vm409_vm2, %v6040_v53  ;;  %v3494_v53 = vsel %vm995_vm3, %v7268_v49, %v3493_v22  ;;  %v7327_v49 = vld [vmem:[#allocation52_spill] sm:$0xff]  ;;  %v7345_v22 = vld [vmem:[#allocation31_spill] sm:$0xff] }
 0x108   : > { %5260 = vmatmul.mubr.msk.f32.gmra.mrb[4].mxu0 %vm409_vm2, %v3484_v50  ;;  %5036 = vmatprep.mubr.msk.f32.mxu1 %vm409_vm2, %v6081_v43  ;;  %v7319_v43 = vld [vmem:[#allocation47_spill] sm:$0xff]  ;;  %v1880_v25 = vrot.slane %v7327_v49, 1  ;;  %v3534_v50 = vsel %vm995_vm3, %v7343_v37, %v3533_v4  ;;  %v3538_v30 = vrot.slane %v7345_v22, 2 }
 0x109   : > { %5262 = vmatprep.mubr.msk.f32.mxu0 %vm409_vm2, %v6144_v23  ;;  %v3513_v23 = vrot.slane %v6726_v32, 2  ;;  %v3524_v32 = vsel %vm995_vm3, %v7332_v2, %v3523_v0 }
 0x10b   : > { %5037 = vmatmul.mubr.msk.f32.gmra.mrb[22].mxu1 %vm409_vm2, %v6084_v29  ;;  %v3503_v29 = vrot.slane %v6696_v16, 2  ;;  %v1881_v16 = vsel %vm326_vm1, %v7331_v8, %v1880_v25 }
 0x10c   : > { %5263 = vmatmul.mubr.msk.f32.gmra.mrb[6].mxu0 %vm409_vm2, %v3489_v44  ;;  %5039 = vmatprep.mubr.msk.f32.mxu1 %vm409_vm2, %v6120_v27  ;;  %v3508_v27 = vrot.slane %v6711_v28, 2  ;;  %v7333_v28 = vld [vmem:[#allocation56_spill] sm:$0xff]  ;;  %v1895_v44 = vrot.slane %v7344_v26, 1 }
 0x10d   : > { %5265 = vmatprep.mubr.msk.f32.mxu0 %vm409_vm2, %v6201_v62  ;;  %v7322_v62 = vld [vmem:[#allocation49_spill] sm:$0xff] }
 0x10e   : > { %v3509_v52 = vsel %vm995_vm3, %v7319_v43, %v3508_v27  ;;  %v3543_v43 = vrot.slane %v6812_v7, 2 }
 0x10f   : > { %5040 = vmatmul.mubr.msk.f32.gmra.mrb[24].mxu1 %vm409_vm2, %v6125_v54  ;;  %v3504_v54 = vsel %vm995_vm3, %v6235_v10, %v3503_v29  ;;  %v3514_v10 = vsel %vm995_vm3, %v7321_v5, %v3513_v23  ;;  %v3546_v23 = vrot.slane %v6613_v3, 2  ;;  %v3548_v3 = vrot.slane %v6831_v56, 2 }
 0x110   : > { %5266 = vmatmul.mubr.msk.f32.gmra.mrb[8].mxu0 %vm409_vm2, %v3494_v53  ;;  %5042 = vmatprep.mubr.msk.f32.mxu1 %vm409_vm2, %v6159_v6  ;;  %v7346_v53 = vld [vmem:[#allocation43_spill] sm:$0xff] }
 0x111   : > { %5268 = vmatprep.mubr.msk.f32.mxu0 %vm409_vm2, %v6226_v1  ;;  %v3518_v1 = vrot.slane %v6740_v31, 2 }
 0x113   : > { %5043 = vmatmul.mubr.msk.f32.gmra.mrb[26].mxu1 %vm409_vm2, %v6162_v51  ;;  %v1870_v51 = vrot.slane %v7318_v55, 1  ;;  %v3519_v45 = vsel %vm995_vm3, %v7326_v42, %v3518_v1  ;;  %v7350_v55 = vld [vmem:[#allocation65_spill] sm:$0xff]  ;;  %v3549_v1 = vsel %vm995_vm3, %v3546_v23, %v3548_v3 }
 0x114   : > { %5269 = vmatmul.mubr.msk.f32.gmra.mrb[10].mxu0 %vm409_vm2, %v3499_v39  ;;  %5045 = vmatprep.mubr.msk.f32.mxu1 %vm409_vm2, %v6204_v24  ;;  %v1875_v24 = vrot.slane %v7322_v62, 1  ;;  %v7348_v39 = vld [vmem:[#allocation40_spill] sm:$0xff] }
 0x115   : > { %5271 = vmatprep.mubr.msk.f32.mxu0 %vm409_vm2, %v6258_v41  ;;  %v1871_v6 = vsel %vm326_vm1, %v7301_v36, %v1870_v51  ;;  %v7325_v41 = vld [vmem:[#allocation25_spill] sm:$0xff]  ;;  %v7334_v36 = vld [vmem:[#allocation35_spill] sm:$0xff]  ;;  %v1896_v29 = vsel %vm326_vm1, %v7348_v39, %v1895_v44  ;;  %v1900_v51 = vrot.slane %v7350_v55, 1 }
 0x116   : > { %v3528_v31 = vrot.slane %v7334_v36, 2 }
 0x117   : > { %5046 = vmatmul.mubr.msk.f32.gmra.mrb[28].mxu1 %vm409_vm2, %v6207_v61  ;;  %v7320_v61 = vld [vmem:[#allocation53_spill] sm:$0xff] }
 0x118   : > { %5272 = vmatmul.mubr.msk.f32.gmra.mrb[12].mxu0 %vm409_vm2, %v3504_v54  ;;  %5048 = vmatprep.mubr.msk.f32.mxu1 %vm409_vm2, %v6403_v63  ;;  %v7324_v63 = vld [vmem:[#allocation54_spill] sm:$0xff]  ;;  %v3529_v57 = vsel %vm995_vm3, %v7338_v34, %v3528_v31  ;;  %v7349_v54 = vld [vmem:[#allocation64_spill] sm:$0xff] }
 0x119   : > { %5274 = vmatprep.mubr.msk.f32.mxu0 %vm409_vm2, %v6280_v46  ;;  %v1876_v46 = vsel %vm326_vm1, %v7325_v41, %v1875_v24  ;;  %v3539_v27 = vsel %vm995_vm3, %v7349_v54, %v3538_v30 }
 0x11b   : > { %5049 = vmatmul.mubr.msk.f32.gmra.mrb[30].mxu1 %vm409_vm2, %v6406_v35  ;;  %v7323_v35 = vld [vmem:[#allocation29_spill] sm:$0xff] }
 0x11c   : > { %5275 = vmatmul.mubr.msk.f32.gmra.mrb[14].mxu0 %vm409_vm2, %v3509_v52  ;;  %5077 = vmatprep.mubr.msk.f32.mxu1 %vm409_vm2, %v7300_v13  ;;  %v1885_v13 = vrot.slane %v7333_v28, 1  ;;  %v3545_v52 = vrot.slane %v6598_v20, 2  ;;  %v7354_v20 = vld [vmem:[#allocation68_spill] sm:$0xff] }
 0x11d   : > { %5277 = vmatprep.mubr.msk.f32.mxu0 %vm409_vm2, %v7320_v61  ;;  %v7351_v61 = vld [vmem:[#allocation69_spill] sm:$0xff]  ;;  %v1905_v62 = vrot.slane %v7354_v20, 1 }
 0x11e   : > { %v1886_v58 = vsel %vm326_vm1, %v7337_v14, %v1885_v13  ;;  %v3547_v24 = vsel %vm995_vm3, %v3545_v52, %v3546_v23 }
 0x11f   : > { %5078 = vmatmul.mubr.msk.f32.vlgmr.msra.gmra.mrb[16].mxu1 %vm409_vm2, %v1871_v6  ;;  %v7352_v6 = vld [vmem:[#allocation44_spill] sm:$0xff] }
 0x120   : > { %5278 = vmatmul.mubr.msk.f32.gmra.mrb[16].mxu0 %vm409_vm2, %v3514_v10  ;;  %5080 = vmatprep.mubr.msk.f32.mxu1 %vm409_vm2, %v7323_v35  ;;  %v1901_v5 = vsel %vm326_vm1, %v7352_v6, %v1900_v51  ;;  %v7353_v10 = vld [vmem:[#allocation67_spill] sm:$0xff] }
 0x121   : > { %5280 = vmatprep.mubr.msk.f32.mxu0 %vm409_vm2, %v7324_v63  ;;  %v3544_v7 = vsel %vm995_vm3, %v7353_v10, %v3543_v43 }
 0x123   : > { %5081 = vmatmul.mubr.msk.f32.gmra.mrb[18].mxu1 %vm409_vm2, %v1876_v46 }
 0x124   : > { %5281 = vmatmul.mubr.msk.f32.gmra.mrb[18].mxu0 %vm409_vm2, %v3519_v45  ;;  %5083 = vmatprep.mubr.msk.f32.mxu1 %vm409_vm2, %v7329_v17 }
 0x125   : > { %5283 = vmatprep.mubr.msk.f32.mxu0 %vm409_vm2, %v7330_v19 }
 0x127   : > { %5084 = vmatmul.mubr.msk.f32.gmra.mrb[20].mxu1 %vm409_vm2, %v1881_v16 }
 0x128   : > { %5284 = vmatmul.mubr.msk.f32.gmra.mrb[20].mxu0 %vm409_vm2, %v3524_v32  ;;  %5086 = vmatprep.mubr.msk.f32.mxu1 %vm409_vm2, %v7335_v15 }
 0x129   : > { %5286 = vmatprep.mubr.msk.f32.mxu0 %vm409_vm2, %v7336_v9 }
 0x12b   : > { %5087 = vmatmul.mubr.msk.f32.gmra.mrb[22].mxu1 %vm409_vm2, %v1886_v58 }
 0x12c   : > { %5287 = vmatmul.mubr.msk.f32.gmra.mrb[22].mxu0 %vm409_vm2, %v3529_v57  ;;  %5089 = vmatprep.mubr.msk.f32.mxu1 %vm409_vm2, %v7340_v60 }
 0x12d   : > { %5289 = vmatprep.mubr.msk.f32.mxu0 %vm409_vm2, %v7341_v12 }
 0x12f   : > { %5090 = vmatmul.mubr.msk.f32.gmra.mrb[24].mxu1 %vm409_vm2, %v1891_v18 }
 0x130   : > { %5290 = vmatmul.mubr.msk.f32.gmra.mrb[24].mxu0 %vm409_vm2, %v3534_v50  ;;  %5092 = vmatprep.mubr.msk.f32.mxu1 %vm409_vm2, %v7346_v53 }
 0x131   : > { %5292 = vmatprep.mubr.msk.f32.mxu0 %vm409_vm2, %v7347_v38 }
 0x133   : > { %5093 = vmatmul.mubr.msk.f32.gmra.mrb[26].mxu1 %vm409_vm2, %v1896_v29 }
 0x134   : > { %5293 = vmatmul.mubr.msk.f32.gmra.mrb[26].mxu0 %vm409_vm2, %v3539_v27  ;;  %5095 = vmatprep.mubr.msk.f32.mxu1 %vm409_vm2, %v7315_v47  ;;  %v1906_v47 = vsel %vm326_vm1, %v6809_v21, %v1905_v62 }
 0x135   : > { %5295 = vmatprep.mubr.msk.f32.mxu0 %vm409_vm2, %v7351_v61 }
 0x137   : > { %5096 = vmatmul.mubr.msk.f32.gmra.mrb[28].mxu1 %vm409_vm2, %v1901_v5 }
 0x138   : > { %5296 = vmatmul.mubr.msk.f32.gmra.mrb[28].mxu0 %vm409_vm2, %v3544_v7  ;;  %5098 = vmatprep.mubr.msk.f32.mxu1 %vm409_vm2, %v6828_v48 }
 0x139   : > { %5298 = vmatprep.mubr.msk.f32.mxu0 %vm409_vm2, %v3547_v24 }
 0x13b   : > { %5099 = vmatmul.mubr.msk.f32.gmra.mrb[30].mxu1 %vm409_vm2, %v1906_v47 }
 0x13c   : > { %5299 = vmatmul.mubr.msk.f32.gmra.mrb[30].mxu0 %vm409_vm2, %v3549_v1 }
 0x1b2   : > { %v5005_v56 = vpop.f32.mrb[0].mxu1 }
 0x1b3   : > { %v1620_v35 = vpop.f32.mrb[1].mxu1 }
 0x1b6   : > { %v5008_v63 = vpop.f32.mrb[2].mxu1 }
 0x1b7   : > { %v1630_v41 = vpop.f32.mrb[3].mxu1 }
 0x1ba   : > { %v5011_v46 = vpop.f32.mrb[4].mxu1 }
 0x1bb   : > { %v1640_v42 = vpop.f32.mrb[5].mxu1 }
 0x1be   : > { %v5014_v48 = vpop.f32.mrb[6].mxu1 }
 0x1bf   : > { %v1650_v45 = vpop.f32.mrb[7].mxu1 }
 0x1c2   : > { %v5017_v49 = vpop.f32.mrb[8].mxu1 }
 0x1c3   : > { %v1660_v25 = vpop.f32.mrb[9].mxu1 }
 0x1c6   : > { %v5020_v21 = vpop.f32.mrb[10].mxu1 }
 0x1c7   : > { %v7033_v40 = vpop.f32.mrb[11].mxu1 }
 0x1ca   : > { %v7035_v0 = vpop.f32.mrb[12].mxu1 }
 0x1cb   : > { %v7037_v17 = vpop.f32.mrb[13].mxu1 }
 0x1ce   : > { %v7039_v19 = vpop.f32.mrb[14].mxu1 }
 0x1cf   : > { %v7041_v8 = vpop.f32.mrb[15].mxu1 }
 0x1d3   : > { %v5255_v16 = vpop.f32.mrb[0].mxu0 }
 0x1d4   : > { %v5303_v2 = vadd.f32 %v5255_v16, %v5005_v56  ;;  %v3685_v32 = vpop.f32.mrb[1].mxu0 }
 0x1d5   : > { %v5304_v28 = vadd.f32 %v3685_v32, %v1620_v35 }
 0x1d6   : > { %3877 = vst [vmem:[%s5670_s24 + $0x8] sm:$0xff] %v5303_v2  ;;  %v3950_v13 = vmul.f32 %v5303_v2, %v5303_v2 }
 0x1d7   : > { %3876 = vst [vmem:[%s5670_s24] sm:$0xff] %v5304_v28  ;;  %v3909_v36 = vadd.f32 %v5304_v28, %v5303_v2  ;;  %v3949_v31 = vmul.f32 %v5304_v28, %v5304_v28  ;;  %v5258_v15 = vpop.f32.mrb[2].mxu0 }
 0x1d8   : > { %v5305_v9 = vadd.f32 %v5258_v15, %v5008_v63  ;;  %v3695_v14 = vpop.f32.mrb[3].mxu0 }
 0x1d9   : > { %v3981_v58 = vadd.f32 %v3950_v13, %v3949_v31  ;;  %v5306_v34 = vadd.f32 %v3695_v14, %v1630_v41 }
 0x1da   : > { %3879 = vst [vmem:[%s5670_s24 + $0x18] sm:$0xff] %v5305_v9  ;;  %v3952_v12 = vmul.f32 %v5305_v9, %v5305_v9 }
 0x1db   : > { %3878 = vst [vmem:[%s5670_s24 + $0x10] sm:$0xff] %v5306_v34  ;;  %v3910_v57 = vadd.f32 %v5306_v34, %v3909_v36  ;;  %v3951_v59 = vmul.f32 %v5306_v34, %v5306_v34  ;;  %v5261_v11 = vpop.f32.mrb[4].mxu0 }
 0x1dc   : > { %v5307_v4 = vadd.f32 %v5261_v11, %v5011_v46  ;;  %v3705_v60 = vpop.f32.mrb[5].mxu0 }
 0x1dd   : > { %v3982_v33 = vadd.f32 %v3981_v58, %v3951_v59  ;;  %v5308_v18 = vadd.f32 %v3705_v60, %v1640_v42  ;;  %v3911_v37 = vadd.f32 %v5305_v9, %v3910_v57 }
 0x1de   : > { %3881 = vst [vmem:[%s5670_s24 + $0x28] sm:$0xff] %v5307_v4  ;;  %v3954_v38 = vmul.f32 %v5307_v4, %v5307_v4 }
 0x1df   : > { %3880 = vst [vmem:[%s5670_s24 + $0x20] sm:$0xff] %v5308_v18  ;;  %v3912_v50 = vadd.f32 %v5308_v18, %v3911_v37  ;;  %v3953_v26 = vmul.f32 %v5308_v18, %v5308_v18  ;;  %v3983_v44 = vadd.f32 %v3982_v33, %v3952_v12  ;;  %v5264_v22 = vpop.f32.mrb[6].mxu0 }
 0x1e0   : > { %v5309_v30 = vadd.f32 %v5264_v22, %v5014_v48  ;;  %v3715_v53 = vpop.f32.mrb[7].mxu0 }
 0x1e1   : > { %v3984_v39 = vadd.f32 %v3983_v44, %v3953_v26  ;;  %v5310_v29 = vadd.f32 %v3715_v53, %v1650_v45  ;;  %v3913_v54 = vadd.f32 %v5307_v4, %v3912_v50 }
 0x1e2   : > { %3883 = vst [vmem:[%s5670_s24 + $0x38] sm:$0xff] %v5309_v30  ;;  %v3956_v61 = vmul.f32 %v5309_v30, %v5309_v30 }
 0x1e3   : > { %3882 = vst [vmem:[%s5670_s24 + $0x30] sm:$0xff] %v5310_v29  ;;  %v3914_v27 = vadd.f32 %v5310_v29, %v3913_v54  ;;  %v3955_v55 = vmul.f32 %v5310_v29, %v5310_v29  ;;  %v3985_v51 = vadd.f32 %v3984_v39, %v3954_v38  ;;  %v5267_v43 = vpop.f32.mrb[8].mxu0 }
 0x1e4   : > { %v5311_v52 = vadd.f32 %v5267_v43, %v5017_v49  ;;  %v3725_v23 = vpop.f32.mrb[9].mxu0 }
 0x1e5   : > { %v3986_v6 = vadd.f32 %v3985_v51, %v3955_v55  ;;  %v5312_v5 = vadd.f32 %v3725_v23, %v1660_v25  ;;  %v3915_v10 = vadd.f32 %v5309_v30, %v3914_v27 }
 0x1e6   : > { %3885 = vst [vmem:[%s5670_s24 + $0x48] sm:$0xff] %v5311_v52  ;;  %v3958_v1 = vmul.f32 %v5311_v52, %v5311_v52 }
 0x1e7   : > { %3884 = vst [vmem:[%s5670_s24 + $0x40] sm:$0xff] %v5312_v5  ;;  %v3916_v7 = vadd.f32 %v5312_v5, %v3915_v10  ;;  %v3957_v20 = vmul.f32 %v5312_v5, %v5312_v5  ;;  %v3987_v62 = vadd.f32 %v3986_v6, %v3956_v61  ;;  %v5270_v3 = vpop.f32.mrb[10].mxu0 }
 0x1e8   : > { %v5313_v24 = vadd.f32 %v5270_v3, %v5020_v21  ;;  %v3735_v47 = vpop.f32.mrb[11].mxu0 }
 0x1e9   : > { %v3988_v56 = vadd.f32 %v3987_v62, %v3957_v20  ;;  %v5314_v35 = vadd.f32 %v3735_v47, %v7033_v40  ;;  %v3917_v63 = vadd.f32 %v5311_v52, %v3916_v7 }
 0x1ea   : > { %3887 = vst [vmem:[%s5670_s24 + $0x58] sm:$0xff] %v5313_v24  ;;  %v3960_v25 = vmul.f32 %v5313_v24, %v5313_v24 }
 0x1eb   : > { %3886 = vst [vmem:[%s5670_s24 + $0x50] sm:$0xff] %v5314_v35  ;;  %v3918_v41 = vadd.f32 %v5314_v35, %v3917_v63  ;;  %v3959_v46 = vmul.f32 %v5314_v35, %v5314_v35  ;;  %v3989_v42 = vadd.f32 %v3988_v56, %v3958_v1  ;;  %v5273_v48 = vpop.f32.mrb[12].mxu0 }
 0x1ec   : > { %v5315_v45 = vadd.f32 %v5273_v48, %v7035_v0  ;;  %v3745_v49 = vpop.f32.mrb[13].mxu0 }
 0x1ed   : > { %v3990_v21 = vadd.f32 %v3989_v42, %v3959_v46  ;;  %v5316_v16 = vadd.f32 %v3745_v49, %v7037_v17  ;;  %v3919_v2 = vadd.f32 %v5313_v24, %v3918_v41 }
 0x1ee   : > { %3889 = vst [vmem:[%s5670_s24 + $0x68] sm:$0xff] %v5315_v45  ;;  %v3962_v15 = vmul.f32 %v5315_v45, %v5315_v45 }
 0x1ef   : > { %3888 = vst [vmem:[%s5670_s24 + $0x60] sm:$0xff] %v5316_v16  ;;  %v3920_v40 = vadd.f32 %v5316_v16, %v3919_v2  ;;  %v3961_v32 = vmul.f32 %v5316_v16, %v5316_v16  ;;  %v3991_v28 = vadd.f32 %v3990_v21, %v3960_v25  ;;  %v5276_v13 = vpop.f32.mrb[14].mxu0 }
 0x1f0   : > { %v5317_v36 = vadd.f32 %v5276_v13, %v7039_v19  ;;  %v3755_v31 = vpop.f32.mrb[15].mxu0 }
 0x1f1   : > { %v3992_v9 = vadd.f32 %v3991_v28, %v3961_v32  ;;  %v5318_v0 = vadd.f32 %v3755_v31, %v7041_v8  ;;  %v3921_v14 = vadd.f32 %v5315_v45, %v3920_v40 }
 0x1f2   : > { %3891 = vst [vmem:[%s5670_s24 + $0x78] sm:$0xff] %v5317_v36  ;;  %v5079_v57 = vpop.f32.mrb[16].mxu1  ;;  %v3964_v12 = vmul.f32 %v5317_v36, %v5317_v36 }
 0x1f3   : > { %3890 = vst [vmem:[%s5670_s24 + $0x70] sm:$0xff] %v5318_v0  ;;  %v3922_v17 = vadd.f32 %v5318_v0, %v3921_v14  ;;  %v3963_v58 = vmul.f32 %v5318_v0, %v5318_v0  ;;  %v3993_v34 = vadd.f32 %v3992_v9, %v3962_v15  ;;  %v5279_v59 = vpop.f32.mrb[16].mxu0  ;;  %v2122_v4 = vpop.f32.mrb[17].mxu1 }
 0x1f4   : > { %v5319_v11 = vadd.f32 %v5279_v59, %v5079_v57  ;;  %v3765_v60 = vpop.f32.mrb[17].mxu0 }
 0x1f5   : > { %v3994_v19 = vadd.f32 %v3993_v34, %v3963_v58  ;;  %v5320_v33 = vadd.f32 %v3765_v60, %v2122_v4  ;;  %v3923_v18 = vadd.f32 %v5317_v36, %v3922_v17 }
 0x1f6   : > { %3893 = vst [vmem:[%s5670_s24 + $0x88] sm:$0xff] %v5319_v11  ;;  %v5082_v26 = vpop.f32.mrb[18].mxu1  ;;  %v3966_v38 = vmul.f32 %v5319_v11, %v5319_v11 }
 0x1f7   : > { %3892 = vst [vmem:[%s5670_s24 + $0x80] sm:$0xff] %v5320_v33  ;;  %v3924_v8 = vadd.f32 %v5320_v33, %v3923_v18  ;;  %v3965_v37 = vmul.f32 %v5320_v33, %v5320_v33  ;;  %v3995_v50 = vadd.f32 %v3994_v19, %v3964_v12  ;;  %v5282_v44 = vpop.f32.mrb[18].mxu0  ;;  %v2132_v30 = vpop.f32.mrb[19].mxu1 }
 0x1f8   : > { %v5321_v22 = vadd.f32 %v5282_v44, %v5082_v26  ;;  %v3775_v53 = vpop.f32.mrb[19].mxu0 }
 0x1f9   : > { %v3996_v39 = vadd.f32 %v3995_v50, %v3965_v37  ;;  %v5322_v29 = vadd.f32 %v3775_v53, %v2132_v30  ;;  %v3925_v54 = vadd.f32 %v5319_v11, %v3924_v8 }
 0x1fa   : > { %3895 = vst [vmem:[%s5670_s24 + $0x98] sm:$0xff] %v5321_v22  ;;  %v5085_v43 = vpop.f32.mrb[20].mxu1  ;;  %v3968_v5 = vmul.f32 %v5321_v22, %v5321_v22 }
 0x1fb   : > { %3894 = vst [vmem:[%s5670_s24 + $0x90] sm:$0xff] %v5322_v29  ;;  %v3926_v27 = vadd.f32 %v5322_v29, %v3925_v54  ;;  %v3967_v55 = vmul.f32 %v5322_v29, %v5322_v29  ;;  %v3997_v51 = vadd.f32 %v3996_v39, %v3966_v38  ;;  %v5285_v52 = vpop.f32.mrb[20].mxu0  ;;  %v2142_v61 = vpop.f32.mrb[21].mxu1 }
 0x1fc   : > { %v5323_v23 = vadd.f32 %v5285_v52, %v5085_v43  ;;  %v3785_v6 = vpop.f32.mrb[21].mxu0 }
 0x1fd   : > { %v3998_v10 = vadd.f32 %v3997_v51, %v3967_v55  ;;  %v5324_v7 = vadd.f32 %v3785_v6, %v2142_v61  ;;  %v3927_v20 = vadd.f32 %v5321_v22, %v3926_v27 }
 0x1fe   : > { %3897 = vst [vmem:[%s5670_s24 + $0xa8] sm:$0xff] %v5323_v23  ;;  %v5088_v47 = vpop.f32.mrb[22].mxu1  ;;  %v3970_v41 = vmul.f32 %v5323_v23, %v5323_v23 }
 0x1ff   : > { %3896 = vst [vmem:[%s5670_s24 + $0xa0] sm:$0xff] %v5324_v7  ;;  %v3928_v62 = vadd.f32 %v5324_v7, %v3927_v20  ;;  %v3969_v3 = vmul.f32 %v5324_v7, %v5324_v7  ;;  %v3999_v24 = vadd.f32 %v3998_v10, %v3968_v5  ;;  %v5288_v1 = vpop.f32.mrb[22].mxu0  ;;  %v2152_v35 = vpop.f32.mrb[23].mxu1 }
 0x200   : > { %v5325_v56 = vadd.f32 %v5288_v1, %v5088_v47  ;;  %v3795_v63 = vpop.f32.mrb[23].mxu0 }
 0x201   : > { %v4000_v46 = vadd.f32 %v3999_v24, %v3969_v3  ;;  %v5326_v42 = vadd.f32 %v3795_v63, %v2152_v35  ;;  %v3929_v48 = vadd.f32 %v5323_v23, %v3928_v62 }
 0x202   : > { %3899 = vst [vmem:[%s5670_s24 + $0xb8] sm:$0xff] %v5325_v56  ;;  %v5091_v21 = vpop.f32.mrb[24].mxu1  ;;  %v3972_v28 = vmul.f32 %v5325_v56, %v5325_v56 }
 0x203   : > { %3898 = vst [vmem:[%s5670_s24 + $0xb0] sm:$0xff] %v5326_v42  ;;  %v3930_v45 = vadd.f32 %v5326_v42, %v3929_v48  ;;  %v3971_v49 = vmul.f32 %v5326_v42, %v5326_v42  ;;  %v4001_v25 = vadd.f32 %v4000_v46, %v3970_v41  ;;  %v5291_v16 = vpop.f32.mrb[24].mxu0  ;;  %v2162_v40 = vpop.f32.mrb[25].mxu1 }
 0x204   : > { %v5327_v2 = vadd.f32 %v5291_v16, %v5091_v21  ;;  %v3805_v32 = vpop.f32.mrb[25].mxu0  ;;  %v3948_v21 = vld [vmem:[#allocation3] sm:$0x1] }
 0x205   : > { %v4002_v13 = vadd.f32 %v4001_v25, %v3971_v49  ;;  %v5328_v36 = vadd.f32 %v3805_v32, %v2162_v40  ;;  %v3931_v31 = vadd.f32 %v5325_v56, %v3930_v45  ;;  %v3908_v45 = vld [vmem:[#allocation2] sm:$0x1] }
 0x206   : > { %3901 = vst [vmem:[%s5670_s24 + $0xc8] sm:$0xff] %v5327_v2  ;;  %v5094_v14 = vpop.f32.mrb[26].mxu1  ;;  %v3974_v59 = vmul.f32 %v5327_v2, %v5327_v2 }
 0x207   : > { %3900 = vst [vmem:[%s5670_s24 + $0xc0] sm:$0xff] %v5328_v36  ;;  %v3932_v15 = vadd.f32 %v5328_v36, %v3931_v31  ;;  %v3973_v9 = vmul.f32 %v5328_v36, %v5328_v36  ;;  %v4003_v0 = vadd.f32 %v4002_v13, %v3972_v28  ;;  %v5294_v17 = vpop.f32.mrb[26].mxu0  ;;  %v2172_v34 = vpop.f32.mrb[27].mxu1 }
 0x208   : > { %v5329_v58 = vadd.f32 %v5294_v17, %v5094_v14  ;;  %v3815_v57 = vpop.f32.mrb[27].mxu0 }
 0x209   : > { %v4004_v11 = vadd.f32 %v4003_v0, %v3973_v9  ;;  %v5330_v4 = vadd.f32 %v3815_v57, %v2172_v34  ;;  %v3933_v60 = vadd.f32 %v5327_v2, %v3932_v15 }
 0x20a   : > { %3903 = vst [vmem:[%s5670_s24 + $0xd8] sm:$0xff] %v5329_v58  ;;  %v5097_v18 = vpop.f32.mrb[28].mxu1  ;;  %v3976_v44 = vmul.f32 %v5329_v58, %v5329_v58 }
 0x20b   : > { %3902 = vst [vmem:[%s5670_s24 + $0xd0] sm:$0xff] %v5330_v4  ;;  %v3934_v12 = vadd.f32 %v5330_v4, %v3933_v60  ;;  %v3975_v19 = vmul.f32 %v5330_v4, %v5330_v4  ;;  %v4005_v33 = vadd.f32 %v4004_v11, %v3974_v59  ;;  %v5297_v8 = vpop.f32.mrb[28].mxu0  ;;  %v2182_v50 = vpop.f32.mrb[29].mxu1 }
 0x20c   : > { %v5331_v37 = vadd.f32 %v5297_v8, %v5097_v18  ;;  %v3825_v26 = vpop.f32.mrb[29].mxu0 }
 0x20d   : > { %v4006_v22 = vadd.f32 %v4005_v33, %v3975_v19  ;;  %v5332_v30 = vadd.f32 %v3825_v26, %v2182_v50  ;;  %v3935_v53 = vadd.f32 %v5329_v58, %v3934_v12 }
 0x20e   : > { %3905 = vst [vmem:[%s5670_s24 + $0xe8] sm:$0xff] %v5331_v37  ;;  %v5100_v54 = vpop.f32.mrb[30].mxu1  ;;  %v3978_v52 = vmul.f32 %v5331_v37, %v5331_v37 }
 0x20f   : > { %3904 = vst [vmem:[%s5670_s24 + $0xe0] sm:$0xff] %v5332_v30  ;;  %v3936_v38 = vadd.f32 %v5332_v30, %v3935_v53  ;;  %v3977_v39 = vmul.f32 %v5332_v30, %v5332_v30  ;;  %v4007_v29 = vadd.f32 %v4006_v22, %v3976_v44  ;;  %v5300_v27 = vpop.f32.mrb[30].mxu0  ;;  %v2192_v51 = vpop.f32.mrb[31].mxu1 }
 0x210   : > { %v5333_v55 = vadd.f32 %v5300_v27, %v5100_v54  ;;  %v3835_v43 = vpop.f32.mrb[31].mxu0 }
 0x211   : > { %v4008_v23 = vadd.f32 %v4007_v29, %v3977_v39  ;;  %v5334_v61 = vadd.f32 %v3835_v43, %v2192_v51  ;;  %v3937_v6 = vadd.f32 %v5331_v37, %v3936_v38 }
 0x212   : > { %3907 = vst [vmem:[%s5670_s24 + $0xf8] sm:$0xff] %v5333_v55  ;;  %v3980_v20 = vmul.f32 %v5333_v55, %v5333_v55 }
 0x213   : > { %3906 = vst [vmem:[%s5670_s24 + $0xf0] sm:$0xff] %v5334_v61  ;;  %v3938_v5 = vadd.f32 %v5334_v61, %v3937_v6  ;;  %v3979_v10 = vmul.f32 %v5334_v61, %v5334_v61  ;;  %v4009_v7 = vadd.f32 %v4008_v23, %v3978_v52 }
 0x215   : > { %v3939_v62 = vadd.f32 %v5333_v55, %v3938_v5  ;;  %v4010_v3 = vadd.f32 %v4009_v7, %v3979_v10 }
 0x217   : > { %v3940_v24 = vrot.slane %v3939_v62, 4  ;;  %v4011_v47 = vadd.f32 %v4010_v3, %v3980_v20 }
 0x219   : > { %v3941_v1 = vadd.f32 %v3940_v24, %v3939_v62  ;;  %v4012_v56 = vrot.slane %v4011_v47, 4 }
 0x21b   : > { %v3942_v35 = vrot.slane %v3941_v1, 2  ;;  %v4013_v63 = vadd.f32 %v4012_v56, %v4011_v47 }
 0x21d   : > { %v3943_v41 = vadd.f32 %v3942_v35, %v3941_v1  ;;  %v4014_v46 = vrot.slane %v4013_v63, 2 }
 0x21f   : > { %v3944_v42 = vrot.slane %v3943_v41, 1  ;;  %v4015_v48 = vadd.f32 %v4014_v46, %v4013_v63 }
 0x221   : > { %v3945_v49 = vadd.f32 %v3944_v42, %v3943_v41  ;;  %v4016_v25 = vrot.slane %v4015_v48, 1  ;;  %4024 = sbr.rel (!%p4020_p6) target bundleno = 560 (0x230), region = 36 }
 0x223   : > { %v3946_v16 = vadd.f32 %v3945_v49, %v3908_v45  ;;  %v4017_v2 = vadd.f32 %v4016_v25, %v4015_v48 }
 0x225   : > { %3947 = vst [vmem:[#allocation2] sm:$0x1] %v3946_v16  ;;  %v4018_v40 = vadd.f32 %v4017_v2, %v3948_v21 }
 0x227   : > { %4019 = vst [vmem:[#allocation3] sm:$0x1] %v4018_v40 }
 0x22c   : > { %v4025_v32 = vld [vmem:[#allocation2] sm:$0x1] }
 0x22d   : > { %4026 = vst [vmem:[%s7100_s3] sm:$0x1] %v4025_v32 }
 0x22e   : > { %v4027_v28 = vld [vmem:[#allocation3] sm:$0x1] }
 0x22f   : > { %4028 = vst [vmem:[%s7101_s4] sm:$0x1] %v4027_v28 }
 0x230 PF: > { %s15_s17 = sadd.s32 1, %s5616_s17   ;;  %s7355_s15 = smov %s5612_s16 }
 0x231   : > { %p12_p7 = scmp.ge.s32.totalorder %s15_s17, 4   ;;  %s7356_s16 = smov %s7358_s18 }
 0x233   :  { %14 = sbr.rel (!%p12_p7) target bundleno = 2 (0x2), region = 93 }

</bundles_post_ra>
